<compile_context>
chip_gen: v6e
topology: v6e:2x2x1
jax: 0.10.0
libtpu: 0.0.40
codegen_flags: <defaults>
</compile_context>

<pallas_src>
import math
import functools

import jax
import jax.numpy as jnp
from jax.experimental import pallas as pl
from jax.experimental.pallas import tpu as pltpu


# ----------------------------- config ---------------------------------------
N_FEATURE = 4
N_EMBD = 32
N_HEAD = 4
N_LAYER = 2
BLOCK_SIZE = 16
LN_EPS = 1e-5
NEG_INF = -1e30   # large finite negative instead of -inf (robust vs inf-inf)


def _layernorm(v, w, b):
    mu = jnp.mean(v, axis=-1, keepdims=True)
    var = jnp.mean((v - mu) ** 2, axis=-1, keepdims=True)
    return (v - mu) * jax.lax.rsqrt(var + LN_EPS) * w + b


# ----------------------------- fused kernel ----------------------------------
def gpt_kernel(x_ref,
               wte_w_ref, wte_b_ref, wpe_ref,
               ln1w_ref, ln1b_ref,
               wqkv_ref, bqkv_ref, wproj_ref, bproj_ref,
               ln2w_ref, ln2b_ref,
               wfc_ref, bfc_ref, wcproj_ref, bcproj_ref,
               lnfw_ref, lnfb_ref, finw_ref, finb_ref,
               o_ref, *, n_layer, n_head, head_dim, seq_len, b_blk):
    H, D, T = n_head, head_dim, seq_len
    E = H * D
    BT = b_blk * T
    scale = 1.0 / math.sqrt(D)

    # ---- embedding (token linear + positional) ------------------------------
    x = x_ref[...].reshape(BT, -1)                                   # (B_blk*T, F)
    y = jnp.dot(x, wte_w_ref[...], preferred_element_type=jnp.float32) + wte_b_ref[...]
    pos = wpe_ref[...][0:T]                                          # (T, E)
    y = (y.reshape(b_blk, T, E) + pos).reshape(BT, E)                # (B_blk*T, E)

    # causal mask built once, broadcast over the folded (head*batch) dim
    row = jax.lax.broadcasted_iota(jnp.int32, (1, T, T), 1)
    col = jax.lax.broadcasted_iota(jnp.int32, (1, T, T), 2)
    causal = col <= row                                              # (1, T, T)

    def split_heads(m):                       # (BT, E) -> (H*b_blk, T, D)
        heads = [m[:, h * D:(h + 1) * D].reshape(b_blk, T, D) for h in range(H)]
        return jnp.stack(heads, axis=0).reshape(H * b_blk, T, D)

    def merge_heads(m):                       # (H*b_blk, T, D) -> (BT, E)
        m = m.reshape(H, b_blk, T, D)
        return jnp.concatenate([m[h] for h in range(H)], axis=-1).reshape(BT, E)

    # ---- transformer blocks (weights resident in VMEM, static layer loop) ---
    for li in range(n_layer):
        # ---- attention branch ------------------------------------------------
        h = _layernorm(y, ln1w_ref[li], ln1b_ref[li])                 # (BT, E)
        qkv = jnp.dot(h, wqkv_ref[li],
                      preferred_element_type=jnp.float32) + bqkv_ref[li]   # (BT, 3E)
        q = split_heads(qkv[:, 0 * E:1 * E])                          # (H*b, T, D)
        k = split_heads(qkv[:, 1 * E:2 * E])
        v = split_heads(qkv[:, 2 * E:3 * E])

        att = jnp.einsum("bqd,bkd->bqk", q, k,
                         preferred_element_type=jnp.float32) * scale  # (H*b, T, T)
        att = jnp.where(causal, att, NEG_INF)
        att = att - jnp.max(att, axis=-1, keepdims=True)
        p = jnp.exp(att)
        p = p * pl.reciprocal(jnp.sum(p, axis=-1, keepdims=True), approx=True)

        oh = jnp.einsum("bqk,bkd->bqd", p, v,
                        preferred_element_type=jnp.float32)           # (H*b, T, D)
        oh = merge_heads(oh)                                          # (BT, E)
        y = y + jnp.dot(oh, wproj_ref[li],
                        preferred_element_type=jnp.float32) + bproj_ref[li]

        # ---- MLP branch --------------------------------------------------------
        h2 = _layernorm(y, ln2w_ref[li], ln2b_ref[li])
        a = jnp.dot(h2, wfc_ref[li], preferred_element_type=jnp.float32) + bfc_ref[li]
        g = 0.5 * a * (1.0 + jnp.tanh(math.sqrt(2.0 / math.pi)
                                      * (a + 0.044715 * a * a * a)))
        y = y + jnp.dot(g, wcproj_ref[li],
                        preferred_element_type=jnp.float32) + bcproj_ref[li]

    # ---- final layernorm + fused E->1 projection (kernel epilogue) ----------
    yf = _layernorm(y, lnfw_ref[...], lnfb_ref[...])
    out = jnp.dot(yf, finw_ref[...], preferred_element_type=jnp.float32) + finb_ref[...]
    o_ref[...] = out.reshape(b_blk, T, 1).astype(o_ref.dtype)


# ----------------------------- one-time weight packing ------------------------
def pack_params(params):
    """Stack per-layer weights along a leading [N_LAYER, ...] axis.

    Called ONCE outside the jitted forward path, so the per-call dispatch is a
    single pallas_call with no restructuring ops in front of it.
    """
    blocks = params["blocks"]

    def stack(name):
        return jnp.stack([b[name] for b in blocks], axis=0)

    return {
        "wte_w": params["wte_w"], "wte_b": params["wte_b"], "wpe": params["wpe"],
        "ln1_w": stack("ln1_w"), "ln1_b": stack("ln1_b"),
        "attn_w": stack("attn_w"), "attn_b": stack("attn_b"),
        "proj_w": stack("proj_w"), "proj_b": stack("proj_b"),
        "ln2_w": stack("ln2_w"), "ln2_b": stack("ln2_b"),
        "fc_w": stack("fc_w"), "fc_b": stack("fc_b"),
        "cproj_w": stack("cproj_w"), "cproj_b": stack("cproj_b"),
        "lnf_w": params["lnf_w"], "lnf_b": params["lnf_b"],
        "fin_w": params["fin_w"], "fin_b": params["fin_b"],
    }


# ----------------------------- wrapper ---------------------------------------
def _pick_bblk(B):
    """Batch elements per grid step: keep >=2 parallel steps when B >= 2
    (v7x has 2 TensorCores); otherwise one step with everything."""
    if B < 2:
        return max(B, 1)
    for bb in range(B // 2, 0, -1):
        if B % bb == 0:
            return bb
    return 1


@jax.jit
def gpt_forward_pallas(x, packed):
    B, T, F = x.shape
    assert T <= BLOCK_SIZE, f"seq len {T} > block size {BLOCK_SIZE}"
    E, L, H = N_EMBD, N_LAYER, N_HEAD
    D = E // H
    b_blk = _pick_bblk(B)
    grid = (B // b_blk,)

    kernel = functools.partial(gpt_kernel, n_layer=L, n_head=H, head_dim=D,
                               seq_len=T, b_blk=b_blk)

    def _ws(shape):
        n = len(shape)
        return pl.BlockSpec(shape, lambda b, _n=n: (0,) * _n)

    return pl.pallas_call(
        kernel,
        out_shape=jax.ShapeDtypeStruct((B, T, 1), jnp.float32),
        grid=grid,
        in_specs=[
            pl.BlockSpec((b_blk, T, F), lambda b: (b, 0, 0)),     # x
            _ws((F, E)), _ws((1, E)),                             # wte w, b
            _ws((BLOCK_SIZE, E)),                                 # wpe (sliced in-kernel)
            _ws((L, 1, E)), _ws((L, 1, E)),                       # ln1 w, b
            _ws((L, E, 3 * E)), _ws((L, 1, 3 * E)),               # fused QKV w, b
            _ws((L, E, E)), _ws((L, 1, E)),                       # attn proj w, b
            _ws((L, 1, E)), _ws((L, 1, E)),                       # ln2 w, b
            _ws((L, E, 4 * E)), _ws((L, 1, 4 * E)),               # c_fc w, b
            _ws((L, 4 * E, E)), _ws((L, 1, E)),                   # c_proj (mlp) w, b
            _ws((1, E)), _ws((1, E)),                             # ln_f w, b
            _ws((E, 1)), _ws((1, 1)),                             # final_linear w, b
        ],
        out_specs=pl.BlockSpec((b_blk, T, 1), lambda b: (b, 0, 0)),
        compiler_params=pltpu.CompilerParams(
            dimension_semantics=("parallel",)),
    )(x,
      packed["wte_w"], packed["wte_b"], packed["wpe"],
      packed["ln1_w"], packed["ln1_b"],
      packed["attn_w"], packed["attn_b"], packed["proj_w"], packed["proj_b"],
      packed["ln2_w"], packed["ln2_b"],
      packed["fc_w"], packed["fc_b"], packed["cproj_w"], packed["cproj_b"],
      packed["lnf_w"], packed["lnf_b"], packed["fin_w"], packed["fin_b"])


# ----------------------------- reference (plain JAX) --------------------------
def gpt_forward_ref(x, params):
    B, T, F = x.shape
    y = x @ params["wte_w"] + params["wte_b"][0] + params["wpe"][:T]
    for layer in params["blocks"]:
        h = _layernorm(y, layer["ln1_w"][0], layer["ln1_b"][0])
        qkv = h @ layer["attn_w"] + layer["attn_b"][0]
        q, k, v = jnp.split(qkv, 3, axis=-1)
        hd = N_EMBD // N_HEAD
        q = q.reshape(B, T, N_HEAD, hd).transpose(0, 2, 1, 3)
        k = k.reshape(B, T, N_HEAD, hd).transpose(0, 2, 1, 3)
        v = v.reshape(B, T, N_HEAD, hd).transpose(0, 2, 1, 3)
        att = jnp.einsum("bhtd,bhsd->bhts", q, k) / math.sqrt(hd)
        mask = jnp.tril(jnp.ones((T, T), dtype=bool))
        att = jnp.where(mask, att, -jnp.inf)
        att = jax.nn.softmax(att, axis=-1)
        o = jnp.einsum("bhts,bhsd->bhtd", att, v).transpose(0, 2, 1, 3).reshape(B, T, N_EMBD)
        y = y + o @ layer["proj_w"] + layer["proj_b"][0]
        h2 = _layernorm(y, layer["ln2_w"][0], layer["ln2_b"][0])
        a = h2 @ layer["fc_w"] + layer["fc_b"][0]
        g = 0.5 * a * (1.0 + jnp.tanh(math.sqrt(2.0 / math.pi) * (a + 0.044715 * a ** 3)))
        y = y + g @ layer["cproj_w"] + layer["cproj_b"][0]
    h = _layernorm(y, params["lnf_w"][0], params["lnf_b"][0])
    return h @ params["fin_w"] + params["fin_b"][0]


# ----------------------------- param init -------------------------------------
def init_params(key):
    E, F = N_EMBD, N_FEATURE
    std = 0.02
    ks = list(jax.random.split(key, 32))
    nxt = iter(ks).__next__

    def lin(in_dim, out_dim):
        # stored as (in, out) = transpose of PyTorch's (out, in) Linear weight
        w = jax.random.normal(nxt(), (in_dim, out_dim), jnp.float32) * std
        b = jnp.zeros((1, out_dim), jnp.float32)
        return w, b

    params = {}
    params["wte_w"], params["wte_b"] = lin(F, E)
    params["wpe"] = jax.random.normal(nxt(), (BLOCK_SIZE, E), jnp.float32) * std

    blocks = []
    for _ in range(N_LAYER):
        layer = {}
        layer["ln1_w"] = jnp.ones((1, E), jnp.float32)
        layer["ln1_b"] = jnp.zeros((1, E), jnp.float32)
        layer["attn_w"], layer["attn_b"] = lin(E, 3 * E)
        layer["proj_w"], layer["proj_b"] = lin(E, E)
        layer["ln2_w"] = jnp.ones((1, E), jnp.float32)
        layer["ln2_b"] = jnp.zeros((1, E), jnp.float32)
        layer["fc_w"], layer["fc_b"] = lin(E, 4 * E)
        layer["cproj_w"], layer["cproj_b"] = lin(4 * E, E)
        blocks.append(layer)
    params["blocks"] = blocks

    params["lnf_w"] = jnp.ones((1, E), jnp.float32)
    params["lnf_b"] = jnp.zeros((1, E), jnp.float32)
    params["fin_w"], params["fin_b"] = lin(E, 1)
    return params


# ----------------------------- main --------------------------------------------
if __name__ == "__main__":
    key = jax.random.PRNGKey(0)
    pkey, xkey = jax.random.split(key)
    params = init_params(pkey)
    packed = pack_params(params)            # one-time packing, outside the hot path

    B, T = 2, 8
    x = jax.random.normal(xkey, (B, T, N_FEATURE), jnp.float32)

    out = jax.block_until_ready(gpt_forward_pallas(x, packed))
    ref = jax.block_until_ready(gpt_forward_ref(x, params))

    assert out.shape == (B, T, 1), out.shape
    err = float(jnp.max(jnp.abs(out - ref)))
    # f32 end-to-end; tolerance limited only by the approximate EUP reciprocal
    # used in the softmax normalization.
    assert jnp.allclose(out, ref, atol=1e-4, rtol=1e-4), err

    print("KERNEL_OK")
</pallas_src>

<mosaic_0001>
module attributes {stable_mosaic.version = 11 : i64} {
  func.func @gpt_kernel(%arg0: i32, %arg1: memref<1x8x4xf32, #tpu.memory_space<vmem>>, %arg2: memref<4x32xf32, #tpu.memory_space<vmem>>, %arg3: memref<1x32xf32, #tpu.memory_space<vmem>>, %arg4: memref<16x32xf32, #tpu.memory_space<vmem>>, %arg5: memref<2x1x32xf32, #tpu.memory_space<vmem>>, %arg6: memref<2x1x32xf32, #tpu.memory_space<vmem>>, %arg7: memref<2x32x96xf32, #tpu.memory_space<vmem>>, %arg8: memref<2x1x96xf32, #tpu.memory_space<vmem>>, %arg9: memref<2x32x32xf32, #tpu.memory_space<vmem>>, %arg10: memref<2x1x32xf32, #tpu.memory_space<vmem>>, %arg11: memref<2x1x32xf32, #tpu.memory_space<vmem>>, %arg12: memref<2x1x32xf32, #tpu.memory_space<vmem>>, %arg13: memref<2x32x128xf32, #tpu.memory_space<vmem>>, %arg14: memref<2x1x128xf32, #tpu.memory_space<vmem>>, %arg15: memref<2x128x32xf32, #tpu.memory_space<vmem>>, %arg16: memref<2x1x32xf32, #tpu.memory_space<vmem>>, %arg17: memref<1x32xf32, #tpu.memory_space<vmem>>, %arg18: memref<1x32xf32, #tpu.memory_space<vmem>>, %arg19: memref<32x1xf32, #tpu.memory_space<vmem>>, %arg20: memref<1x1xf32, #tpu.memory_space<vmem>>, %arg21: memref<1x8x1xf32, #tpu.memory_space<vmem>>) attributes {dimension_semantics = [#tpu.dimension_semantics<parallel>], iteration_bounds = array<i64: 2>, scalar_prefetch = 0 : i64, scratch_operands = 0 : i64, tpu.core_type = #tpu.core_type<tc>, window_params = [{transform_indices = @transform_0, window_bounds = array<i64: 1, 8, 4>}, {pipeline_mode = #tpu.pipeline_mode<synchronous>, transform_indices = @transform_1, window_bounds = array<i64: 4, 32>}, {pipeline_mode = #tpu.pipeline_mode<synchronous>, transform_indices = @transform_2, window_bounds = array<i64: 1, 32>}, {pipeline_mode = #tpu.pipeline_mode<synchronous>, transform_indices = @transform_3, window_bounds = array<i64: 16, 32>}, {pipeline_mode = #tpu.pipeline_mode<synchronous>, transform_indices = @transform_4, window_bounds = array<i64: 2, 1, 32>}, {pipeline_mode = #tpu.pipeline_mode<synchronous>, transform_indices = @transform_5, window_bounds = array<i64: 2, 1, 32>}, {pipeline_mode = #tpu.pipeline_mode<synchronous>, transform_indices = @transform_6, window_bounds = array<i64: 2, 32, 96>}, {pipeline_mode = #tpu.pipeline_mode<synchronous>, transform_indices = @transform_7, window_bounds = array<i64: 2, 1, 96>}, {pipeline_mode = #tpu.pipeline_mode<synchronous>, transform_indices = @transform_8, window_bounds = array<i64: 2, 32, 32>}, {pipeline_mode = #tpu.pipeline_mode<synchronous>, transform_indices = @transform_9, window_bounds = array<i64: 2, 1, 32>}, {pipeline_mode = #tpu.pipeline_mode<synchronous>, transform_indices = @transform_10, window_bounds = array<i64: 2, 1, 32>}, {pipeline_mode = #tpu.pipeline_mode<synchronous>, transform_indices = @transform_11, window_bounds = array<i64: 2, 1, 32>}, {pipeline_mode = #tpu.pipeline_mode<synchronous>, transform_indices = @transform_12, window_bounds = array<i64: 2, 32, 128>}, {pipeline_mode = #tpu.pipeline_mode<synchronous>, transform_indices = @transform_13, window_bounds = array<i64: 2, 1, 128>}, {pipeline_mode = #tpu.pipeline_mode<synchronous>, transform_indices = @transform_14, window_bounds = array<i64: 2, 128, 32>}, {pipeline_mode = #tpu.pipeline_mode<synchronous>, transform_indices = @transform_15, window_bounds = array<i64: 2, 1, 32>}, {pipeline_mode = #tpu.pipeline_mode<synchronous>, transform_indices = @transform_16, window_bounds = array<i64: 1, 32>}, {pipeline_mode = #tpu.pipeline_mode<synchronous>, transform_indices = @transform_17, window_bounds = array<i64: 1, 32>}, {pipeline_mode = #tpu.pipeline_mode<synchronous>, transform_indices = @transform_18, window_bounds = array<i64: 32, 1>}, {pipeline_mode = #tpu.pipeline_mode<synchronous>, transform_indices = @transform_19, window_bounds = array<i64: 1, 1>}, {transform_indices = @transform_20, window_bounds = array<i64: 1, 8, 1>}]} {
    %c0 = arith.constant 0 : index
    %c0_0 = arith.constant 0 : index
    %c0_1 = arith.constant 0 : index
    %0 = vector.load %arg1[%c0, %c0_0, %c0_1] : memref<1x8x4xf32, #tpu.memory_space<vmem>>, vector<1x8x4xf32>
    %1 = vector.shape_cast %0 : vector<1x8x4xf32> to vector<8x4xf32>
    %c0_2 = arith.constant 0 : index
    %c0_3 = arith.constant 0 : index
    %2 = vector.load %arg2[%c0_2, %c0_3] : memref<4x32xf32, #tpu.memory_space<vmem>>, vector<4x32xf32>
    %cst = arith.constant dense<0.000000e+00> : vector<8x32xf32>
    %3 = tpu.matmul %1, %2, %cst {dimension_numbers = #tpu.dot_dimension_numbers<[1], [0], [0], [1], [0, 0, 1, 1], [], []>} : vector<8x4xf32>, vector<4x32xf32>, vector<8x32xf32> -> vector<8x32xf32>
    %c0_4 = arith.constant 0 : index
    %c0_5 = arith.constant 0 : index
    %4 = vector.load %arg3[%c0_4, %c0_5] : memref<1x32xf32, #tpu.memory_space<vmem>>, vector<1x32xf32>
    %5 = vector.broadcast %4 : vector<1x32xf32> to vector<8x32xf32>
    %6 = arith.addf %3, %5 : vector<8x32xf32>
    %c0_6 = arith.constant 0 : index
    %c0_7 = arith.constant 0 : index
    %7 = vector.load %arg4[%c0_6, %c0_7] : memref<16x32xf32, #tpu.memory_space<vmem>>, vector<16x32xf32>
    %8 = vector.extract_strided_slice %7 {offsets = [0, 0], sizes = [8, 32], strides = [1, 1]} : vector<16x32xf32> to vector<8x32xf32>
    %9 = vector.shape_cast %6 : vector<8x32xf32> to vector<1x8x32xf32>
    %10 = vector.shape_cast %8 : vector<8x32xf32> to vector<1x8x32xf32>
    %11 = arith.addf %9, %10 : vector<1x8x32xf32>
    %12 = vector.shape_cast %11 : vector<1x8x32xf32> to vector<8x32xf32>
    %13 = tpu.iota {dimensions = array<i32: 1>} : vector<1x8x8xi32>
    %14 = tpu.iota {dimensions = array<i32: 2>} : vector<1x8x8xi32>
    %15 = arith.cmpi sle, %14, %13 : vector<1x8x8xi32>
    %c0_8 = arith.constant 0 : index
    %c0_9 = arith.constant 0 : index
    %c0_10 = arith.constant 0 : index
    %16 = vector.load %arg5[%c0_8, %c0_9, %c0_10] : memref<2x1x32xf32, #tpu.memory_space<vmem>>, vector<1x1x32xf32>
    %17 = vector.shape_cast %16 : vector<1x1x32xf32> to vector<1x32xf32>
    %c0_11 = arith.constant 0 : index
    %c0_12 = arith.constant 0 : index
    %c0_13 = arith.constant 0 : index
    %18 = vector.load %arg6[%c0_11, %c0_12, %c0_13] : memref<2x1x32xf32, #tpu.memory_space<vmem>>, vector<1x1x32xf32>
    %19 = vector.shape_cast %18 : vector<1x1x32xf32> to vector<1x32xf32>
    %cst_14 = arith.constant dense<0.000000e+00> : vector<8xf32>
    %20 = vector.multi_reduction <add>, %12, %cst_14 [1] : vector<8x32xf32> to vector<8xf32>
    %21 = vector.shape_cast %20 : vector<8xf32> to vector<8x1xf32>
    %cst_15 = arith.constant 3.200000e+01 : f32
    %22 = vector.broadcast %cst_15 : f32 to vector<8x1xf32>
    %23 = arith.divf %21, %22 : vector<8x1xf32>
    %24 = vector.broadcast %23 : vector<8x1xf32> to vector<8x32xf32>
    %25 = arith.subf %12, %24 : vector<8x32xf32>
    %26 = arith.mulf %25, %25 : vector<8x32xf32>
    %cst_16 = arith.constant dense<0.000000e+00> : vector<8xf32>
    %27 = vector.multi_reduction <add>, %26, %cst_16 [1] : vector<8x32xf32> to vector<8xf32>
    %28 = vector.shape_cast %27 : vector<8xf32> to vector<8x1xf32>
    %cst_17 = arith.constant 3.200000e+01 : f32
    %29 = vector.broadcast %cst_17 : f32 to vector<8x1xf32>
    %30 = arith.divf %28, %29 : vector<8x1xf32>
    %31 = vector.broadcast %23 : vector<8x1xf32> to vector<8x32xf32>
    %32 = arith.subf %12, %31 : vector<8x32xf32>
    %cst_18 = arith.constant 9.99999974E-6 : f32
    %33 = vector.broadcast %cst_18 : f32 to vector<8x1xf32>
    %34 = arith.addf %30, %33 : vector<8x1xf32>
    %35 = math.rsqrt %34 : vector<8x1xf32>
    %36 = vector.broadcast %35 : vector<8x1xf32> to vector<8x32xf32>
    %37 = arith.mulf %32, %36 : vector<8x32xf32>
    %38 = vector.broadcast %17 : vector<1x32xf32> to vector<8x32xf32>
    %39 = arith.mulf %37, %38 : vector<8x32xf32>
    %40 = vector.broadcast %19 : vector<1x32xf32> to vector<8x32xf32>
    %41 = arith.addf %39, %40 : vector<8x32xf32>
    %c0_19 = arith.constant 0 : index
    %c0_20 = arith.constant 0 : index
    %c0_21 = arith.constant 0 : index
    %42 = vector.load %arg7[%c0_19, %c0_20, %c0_21] : memref<2x32x96xf32, #tpu.memory_space<vmem>>, vector<1x32x96xf32>
    %43 = vector.shape_cast %42 : vector<1x32x96xf32> to vector<32x96xf32>
    %cst_22 = arith.constant dense<0.000000e+00> : vector<8x96xf32>
    %44 = tpu.matmul %41, %43, %cst_22 {dimension_numbers = #tpu.dot_dimension_numbers<[1], [0], [0], [1], [0, 0, 1, 1], [], []>} : vector<8x32xf32>, vector<32x96xf32>, vector<8x96xf32> -> vector<8x96xf32>
    %c0_23 = arith.constant 0 : index
    %c0_24 = arith.constant 0 : index
    %c0_25 = arith.constant 0 : index
    %45 = vector.load %arg8[%c0_23, %c0_24, %c0_25] : memref<2x1x96xf32, #tpu.memory_space<vmem>>, vector<1x1x96xf32>
    %46 = vector.shape_cast %45 : vector<1x1x96xf32> to vector<1x96xf32>
    %47 = vector.broadcast %46 : vector<1x96xf32> to vector<8x96xf32>
    %48 = arith.addf %44, %47 : vector<8x96xf32>
    %49 = vector.extract_strided_slice %48 {offsets = [0, 0], sizes = [8, 32], strides = [1, 1]} : vector<8x96xf32> to vector<8x32xf32>
    %50 = vector.extract_strided_slice %49 {offsets = [0, 0], sizes = [8, 8], strides = [1, 1]} : vector<8x32xf32> to vector<8x8xf32>
    %51 = vector.shape_cast %50 : vector<8x8xf32> to vector<1x8x8xf32>
    %52 = vector.extract_strided_slice %49 {offsets = [0, 8], sizes = [8, 8], strides = [1, 1]} : vector<8x32xf32> to vector<8x8xf32>
    %53 = vector.shape_cast %52 : vector<8x8xf32> to vector<1x8x8xf32>
    %54 = vector.extract_strided_slice %49 {offsets = [0, 16], sizes = [8, 8], strides = [1, 1]} : vector<8x32xf32> to vector<8x8xf32>
    %55 = vector.shape_cast %54 : vector<8x8xf32> to vector<1x8x8xf32>
    %56 = vector.extract_strided_slice %49 {offsets = [0, 24], sizes = [8, 8], strides = [1, 1]} : vector<8x32xf32> to vector<8x8xf32>
    %57 = vector.shape_cast %56 : vector<8x8xf32> to vector<1x8x8xf32>
    %58 = vector.shape_cast %51 : vector<1x8x8xf32> to vector<1x1x8x8xf32>
    %59 = vector.shape_cast %53 : vector<1x8x8xf32> to vector<1x1x8x8xf32>
    %60 = vector.shape_cast %55 : vector<1x8x8xf32> to vector<1x1x8x8xf32>
    %61 = vector.shape_cast %57 : vector<1x8x8xf32> to vector<1x1x8x8xf32>
    %62 = tpu.concatenate %58, %59, %60, %61 in 0 : vector<1x1x8x8xf32>, vector<1x1x8x8xf32>, vector<1x1x8x8xf32>, vector<1x1x8x8xf32> -> vector<4x1x8x8xf32>
    %63 = vector.shape_cast %62 : vector<4x1x8x8xf32> to vector<4x8x8xf32>
    %64 = vector.extract_strided_slice %48 {offsets = [0, 32], sizes = [8, 32], strides = [1, 1]} : vector<8x96xf32> to vector<8x32xf32>
    %65 = vector.extract_strided_slice %64 {offsets = [0, 0], sizes = [8, 8], strides = [1, 1]} : vector<8x32xf32> to vector<8x8xf32>
    %66 = vector.shape_cast %65 : vector<8x8xf32> to vector<1x8x8xf32>
    %67 = vector.extract_strided_slice %64 {offsets = [0, 8], sizes = [8, 8], strides = [1, 1]} : vector<8x32xf32> to vector<8x8xf32>
    %68 = vector.shape_cast %67 : vector<8x8xf32> to vector<1x8x8xf32>
    %69 = vector.extract_strided_slice %64 {offsets = [0, 16], sizes = [8, 8], strides = [1, 1]} : vector<8x32xf32> to vector<8x8xf32>
    %70 = vector.shape_cast %69 : vector<8x8xf32> to vector<1x8x8xf32>
    %71 = vector.extract_strided_slice %64 {offsets = [0, 24], sizes = [8, 8], strides = [1, 1]} : vector<8x32xf32> to vector<8x8xf32>
    %72 = vector.shape_cast %71 : vector<8x8xf32> to vector<1x8x8xf32>
    %73 = vector.shape_cast %66 : vector<1x8x8xf32> to vector<1x1x8x8xf32>
    %74 = vector.shape_cast %68 : vector<1x8x8xf32> to vector<1x1x8x8xf32>
    %75 = vector.shape_cast %70 : vector<1x8x8xf32> to vector<1x1x8x8xf32>
    %76 = vector.shape_cast %72 : vector<1x8x8xf32> to vector<1x1x8x8xf32>
    %77 = tpu.concatenate %73, %74, %75, %76 in 0 : vector<1x1x8x8xf32>, vector<1x1x8x8xf32>, vector<1x1x8x8xf32>, vector<1x1x8x8xf32> -> vector<4x1x8x8xf32>
    %78 = vector.shape_cast %77 : vector<4x1x8x8xf32> to vector<4x8x8xf32>
    %79 = vector.extract_strided_slice %48 {offsets = [0, 64], sizes = [8, 32], strides = [1, 1]} : vector<8x96xf32> to vector<8x32xf32>
    %80 = vector.extract_strided_slice %79 {offsets = [0, 0], sizes = [8, 8], strides = [1, 1]} : vector<8x32xf32> to vector<8x8xf32>
    %81 = vector.shape_cast %80 : vector<8x8xf32> to vector<1x8x8xf32>
    %82 = vector.extract_strided_slice %79 {offsets = [0, 8], sizes = [8, 8], strides = [1, 1]} : vector<8x32xf32> to vector<8x8xf32>
    %83 = vector.shape_cast %82 : vector<8x8xf32> to vector<1x8x8xf32>
    %84 = vector.extract_strided_slice %79 {offsets = [0, 16], sizes = [8, 8], strides = [1, 1]} : vector<8x32xf32> to vector<8x8xf32>
    %85 = vector.shape_cast %84 : vector<8x8xf32> to vector<1x8x8xf32>
    %86 = vector.extract_strided_slice %79 {offsets = [0, 24], sizes = [8, 8], strides = [1, 1]} : vector<8x32xf32> to vector<8x8xf32>
    %87 = vector.shape_cast %86 : vector<8x8xf32> to vector<1x8x8xf32>
    %88 = vector.shape_cast %81 : vector<1x8x8xf32> to vector<1x1x8x8xf32>
    %89 = vector.shape_cast %83 : vector<1x8x8xf32> to vector<1x1x8x8xf32>
    %90 = vector.shape_cast %85 : vector<1x8x8xf32> to vector<1x1x8x8xf32>
    %91 = vector.shape_cast %87 : vector<1x8x8xf32> to vector<1x1x8x8xf32>
    %92 = tpu.concatenate %88, %89, %90, %91 in 0 : vector<1x1x8x8xf32>, vector<1x1x8x8xf32>, vector<1x1x8x8xf32>, vector<1x1x8x8xf32> -> vector<4x1x8x8xf32>
    %93 = vector.shape_cast %92 : vector<4x1x8x8xf32> to vector<4x8x8xf32>
    "tpu.trace_start"() <{level = 10 : i32, message = "bqd,bkd->bqk"}> : () -> ()
    %cst_26 = arith.constant dense<0.000000e+00> : vector<4x8x8xf32>
    %94 = tpu.matmul %63, %78, %cst_26 {dimension_numbers = #tpu.dot_dimension_numbers<[2], [2], [1], [1], [0, 0, 0, 1, 1, 1], [0], [0]>} : vector<4x8x8xf32>, vector<4x8x8xf32>, vector<4x8x8xf32> -> vector<4x8x8xf32>
    "tpu.trace_stop"() : () -> ()
    %cst_27 = arith.constant 0.353553385 : f32
    %95 = vector.broadcast %cst_27 : f32 to vector<4x8x8xf32>
    %96 = arith.mulf %94, %95 : vector<4x8x8xf32>
    %cst_28 = arith.constant -1.000000e+30 : f32
    %97 = vector.shape_cast %15 : vector<1x8x8xi1> to vector<1x8x8xi1>
    %98 = vector.broadcast %97 : vector<1x8x8xi1> to vector<4x8x8xi1>
    %99 = vector.broadcast %cst_28 : f32 to vector<4x8x8xf32>
    %100 = arith.select %98, %96, %99 : vector<4x8x8xi1>, vector<4x8x8xf32>
    %cst_29 = arith.constant dense<0xFF800000> : vector<4x8xf32>
    %101 = vector.multi_reduction <maximumf>, %100, %cst_29 [2] : vector<4x8x8xf32> to vector<4x8xf32>
    %102 = vector.shape_cast %101 : vector<4x8xf32> to vector<4x8x1xf32>
    %103 = vector.broadcast %102 : vector<4x8x1xf32> to vector<4x8x8xf32>
    %104 = arith.subf %100, %103 : vector<4x8x8xf32>
    %105 = math.exp %104 : vector<4x8x8xf32>
    %cst_30 = arith.constant dense<0.000000e+00> : vector<4x8xf32>
    %106 = vector.multi_reduction <add>, %105, %cst_30 [2] : vector<4x8x8xf32> to vector<4x8xf32>
    %107 = vector.shape_cast %106 : vector<4x8xf32> to vector<4x8x1xf32>
    %108 = tpu.reciprocal %107 {approx = true} : vector<4x8x1xf32> -> vector<4x8x1xf32>
    %109 = vector.broadcast %108 : vector<4x8x1xf32> to vector<4x8x8xf32>
    %110 = arith.mulf %105, %109 : vector<4x8x8xf32>
    "tpu.trace_start"() <{level = 10 : i32, message = "bqk,bkd->bqd"}> : () -> ()
    %cst_31 = arith.constant dense<0.000000e+00> : vector<4x8x8xf32>
    %111 = tpu.matmul %110, %93, %cst_31 {dimension_numbers = #tpu.dot_dimension_numbers<[2], [1], [1], [2], [0, 0, 0, 1, 1, 2], [0], [0]>} : vector<4x8x8xf32>, vector<4x8x8xf32>, vector<4x8x8xf32> -> vector<4x8x8xf32>
    "tpu.trace_stop"() : () -> ()
    %112 = vector.shape_cast %111 : vector<4x8x8xf32> to vector<4x1x8x8xf32>
    %113 = vector.extract_strided_slice %112 {offsets = [0, 0, 0, 0], sizes = [1, 1, 8, 8], strides = [1, 1, 1, 1]} : vector<4x1x8x8xf32> to vector<1x1x8x8xf32>
    %114 = vector.shape_cast %113 : vector<1x1x8x8xf32> to vector<1x8x8xf32>
    %115 = vector.extract_strided_slice %112 {offsets = [1, 0, 0, 0], sizes = [1, 1, 8, 8], strides = [1, 1, 1, 1]} : vector<4x1x8x8xf32> to vector<1x1x8x8xf32>
    %116 = vector.shape_cast %115 : vector<1x1x8x8xf32> to vector<1x8x8xf32>
    %117 = vector.extract_strided_slice %112 {offsets = [2, 0, 0, 0], sizes = [1, 1, 8, 8], strides = [1, 1, 1, 1]} : vector<4x1x8x8xf32> to vector<1x1x8x8xf32>
    %118 = vector.shape_cast %117 : vector<1x1x8x8xf32> to vector<1x8x8xf32>
    %119 = vector.extract_strided_slice %112 {offsets = [3, 0, 0, 0], sizes = [1, 1, 8, 8], strides = [1, 1, 1, 1]} : vector<4x1x8x8xf32> to vector<1x1x8x8xf32>
    %120 = vector.shape_cast %119 : vector<1x1x8x8xf32> to vector<1x8x8xf32>
    %121 = tpu.concatenate %114, %116, %118, %120 in 2 : vector<1x8x8xf32>, vector<1x8x8xf32>, vector<1x8x8xf32>, vector<1x8x8xf32> -> vector<1x8x32xf32>
    %122 = vector.shape_cast %121 : vector<1x8x32xf32> to vector<8x32xf32>
    %c0_32 = arith.constant 0 : index
    %c0_33 = arith.constant 0 : index
    %c0_34 = arith.constant 0 : index
    %123 = vector.load %arg9[%c0_32, %c0_33, %c0_34] : memref<2x32x32xf32, #tpu.memory_space<vmem>>, vector<1x32x32xf32>
    %124 = vector.shape_cast %123 : vector<1x32x32xf32> to vector<32x32xf32>
    %cst_35 = arith.constant dense<0.000000e+00> : vector<8x32xf32>
    %125 = tpu.matmul %122, %124, %cst_35 {dimension_numbers = #tpu.dot_dimension_numbers<[1], [0], [0], [1], [0, 0, 1, 1], [], []>} : vector<8x32xf32>, vector<32x32xf32>, vector<8x32xf32> -> vector<8x32xf32>
    %126 = arith.addf %12, %125 : vector<8x32xf32>
    %c0_36 = arith.constant 0 : index
    %c0_37 = arith.constant 0 : index
    %c0_38 = arith.constant 0 : index
    %127 = vector.load %arg10[%c0_36, %c0_37, %c0_38] : memref<2x1x32xf32, #tpu.memory_space<vmem>>, vector<1x1x32xf32>
    %128 = vector.shape_cast %127 : vector<1x1x32xf32> to vector<1x32xf32>
    %129 = vector.broadcast %128 : vector<1x32xf32> to vector<8x32xf32>
    %130 = arith.addf %126, %129 : vector<8x32xf32>
    %c0_39 = arith.constant 0 : index
    %c0_40 = arith.constant 0 : index
    %c0_41 = arith.constant 0 : index
    %131 = vector.load %arg11[%c0_39, %c0_40, %c0_41] : memref<2x1x32xf32, #tpu.memory_space<vmem>>, vector<1x1x32xf32>
    %132 = vector.shape_cast %131 : vector<1x1x32xf32> to vector<1x32xf32>
    %c0_42 = arith.constant 0 : index
    %c0_43 = arith.constant 0 : index
    %c0_44 = arith.constant 0 : index
    %133 = vector.load %arg12[%c0_42, %c0_43, %c0_44] : memref<2x1x32xf32, #tpu.memory_space<vmem>>, vector<1x1x32xf32>
    %134 = vector.shape_cast %133 : vector<1x1x32xf32> to vector<1x32xf32>
    %cst_45 = arith.constant dense<0.000000e+00> : vector<8xf32>
    %135 = vector.multi_reduction <add>, %130, %cst_45 [1] : vector<8x32xf32> to vector<8xf32>
    %136 = vector.shape_cast %135 : vector<8xf32> to vector<8x1xf32>
    %cst_46 = arith.constant 3.200000e+01 : f32
    %137 = vector.broadcast %cst_46 : f32 to vector<8x1xf32>
    %138 = arith.divf %136, %137 : vector<8x1xf32>
    %139 = vector.broadcast %138 : vector<8x1xf32> to vector<8x32xf32>
    %140 = arith.subf %130, %139 : vector<8x32xf32>
    %141 = arith.mulf %140, %140 : vector<8x32xf32>
    %cst_47 = arith.constant dense<0.000000e+00> : vector<8xf32>
    %142 = vector.multi_reduction <add>, %141, %cst_47 [1] : vector<8x32xf32> to vector<8xf32>
    %143 = vector.shape_cast %142 : vector<8xf32> to vector<8x1xf32>
    %cst_48 = arith.constant 3.200000e+01 : f32
    %144 = vector.broadcast %cst_48 : f32 to vector<8x1xf32>
    %145 = arith.divf %143, %144 : vector<8x1xf32>
    %146 = vector.broadcast %138 : vector<8x1xf32> to vector<8x32xf32>
    %147 = arith.subf %130, %146 : vector<8x32xf32>
    %cst_49 = arith.constant 9.99999974E-6 : f32
    %148 = vector.broadcast %cst_49 : f32 to vector<8x1xf32>
    %149 = arith.addf %145, %148 : vector<8x1xf32>
    %150 = math.rsqrt %149 : vector<8x1xf32>
    %151 = vector.broadcast %150 : vector<8x1xf32> to vector<8x32xf32>
    %152 = arith.mulf %147, %151 : vector<8x32xf32>
    %153 = vector.broadcast %132 : vector<1x32xf32> to vector<8x32xf32>
    %154 = arith.mulf %152, %153 : vector<8x32xf32>
    %155 = vector.broadcast %134 : vector<1x32xf32> to vector<8x32xf32>
    %156 = arith.addf %154, %155 : vector<8x32xf32>
    %c0_50 = arith.constant 0 : index
    %c0_51 = arith.constant 0 : index
    %c0_52 = arith.constant 0 : index
    %157 = vector.load %arg13[%c0_50, %c0_51, %c0_52] : memref<2x32x128xf32, #tpu.memory_space<vmem>>, vector<1x32x128xf32>
    %158 = vector.shape_cast %157 : vector<1x32x128xf32> to vector<32x128xf32>
    %cst_53 = arith.constant dense<0.000000e+00> : vector<8x128xf32>
    %159 = tpu.matmul %156, %158, %cst_53 {dimension_numbers = #tpu.dot_dimension_numbers<[1], [0], [0], [1], [0, 0, 1, 1], [], []>} : vector<8x32xf32>, vector<32x128xf32>, vector<8x128xf32> -> vector<8x128xf32>
    %c0_54 = arith.constant 0 : index
    %c0_55 = arith.constant 0 : index
    %c0_56 = arith.constant 0 : index
    %160 = vector.load %arg14[%c0_54, %c0_55, %c0_56] : memref<2x1x128xf32, #tpu.memory_space<vmem>>, vector<1x1x128xf32>
    %161 = vector.shape_cast %160 : vector<1x1x128xf32> to vector<1x128xf32>
    %162 = vector.broadcast %161 : vector<1x128xf32> to vector<8x128xf32>
    %163 = arith.addf %159, %162 : vector<8x128xf32>
    %cst_57 = arith.constant 5.000000e-01 : f32
    %164 = vector.broadcast %cst_57 : f32 to vector<8x128xf32>
    %165 = arith.mulf %164, %163 : vector<8x128xf32>
    %cst_58 = arith.constant 4.471500e-02 : f32
    %166 = vector.broadcast %cst_58 : f32 to vector<8x128xf32>
    %167 = arith.mulf %166, %163 : vector<8x128xf32>
    %168 = arith.mulf %167, %163 : vector<8x128xf32>
    %169 = arith.mulf %168, %163 : vector<8x128xf32>
    %170 = arith.addf %163, %169 : vector<8x128xf32>
    %cst_59 = arith.constant 0.797884583 : f32
    %171 = vector.broadcast %cst_59 : f32 to vector<8x128xf32>
    %172 = arith.mulf %171, %170 : vector<8x128xf32>
    %173 = math.tanh %172 : vector<8x128xf32>
    %cst_60 = arith.constant 1.000000e+00 : f32
    %174 = vector.broadcast %cst_60 : f32 to vector<8x128xf32>
    %175 = arith.addf %174, %173 : vector<8x128xf32>
    %176 = arith.mulf %165, %175 : vector<8x128xf32>
    %c0_61 = arith.constant 0 : index
    %c0_62 = arith.constant 0 : index
    %c0_63 = arith.constant 0 : index
    %177 = vector.load %arg15[%c0_61, %c0_62, %c0_63] : memref<2x128x32xf32, #tpu.memory_space<vmem>>, vector<1x128x32xf32>
    %178 = vector.shape_cast %177 : vector<1x128x32xf32> to vector<128x32xf32>
    %cst_64 = arith.constant dense<0.000000e+00> : vector<8x32xf32>
    %179 = tpu.matmul %176, %178, %cst_64 {dimension_numbers = #tpu.dot_dimension_numbers<[1], [0], [0], [1], [0, 0, 1, 1], [], []>} : vector<8x128xf32>, vector<128x32xf32>, vector<8x32xf32> -> vector<8x32xf32>
    %180 = arith.addf %130, %179 : vector<8x32xf32>
    %c0_65 = arith.constant 0 : index
    %c0_66 = arith.constant 0 : index
    %c0_67 = arith.constant 0 : index
    %181 = vector.load %arg16[%c0_65, %c0_66, %c0_67] : memref<2x1x32xf32, #tpu.memory_space<vmem>>, vector<1x1x32xf32>
    %182 = vector.shape_cast %181 : vector<1x1x32xf32> to vector<1x32xf32>
    %183 = vector.broadcast %182 : vector<1x32xf32> to vector<8x32xf32>
    %184 = arith.addf %180, %183 : vector<8x32xf32>
    %c1 = arith.constant 1 : index
    %c0_68 = arith.constant 0 : index
    %c0_69 = arith.constant 0 : index
    %185 = vector.load %arg5[%c1, %c0_68, %c0_69] : memref<2x1x32xf32, #tpu.memory_space<vmem>>, vector<1x1x32xf32>
    %186 = vector.shape_cast %185 : vector<1x1x32xf32> to vector<1x32xf32>
    %c1_70 = arith.constant 1 : index
    %c0_71 = arith.constant 0 : index
    %c0_72 = arith.constant 0 : index
    %187 = vector.load %arg6[%c1_70, %c0_71, %c0_72] : memref<2x1x32xf32, #tpu.memory_space<vmem>>, vector<1x1x32xf32>
    %188 = vector.shape_cast %187 : vector<1x1x32xf32> to vector<1x32xf32>
    %cst_73 = arith.constant dense<0.000000e+00> : vector<8xf32>
    %189 = vector.multi_reduction <add>, %184, %cst_73 [1] : vector<8x32xf32> to vector<8xf32>
    %190 = vector.shape_cast %189 : vector<8xf32> to vector<8x1xf32>
    %cst_74 = arith.constant 3.200000e+01 : f32
    %191 = vector.broadcast %cst_74 : f32 to vector<8x1xf32>
    %192 = arith.divf %190, %191 : vector<8x1xf32>
    %193 = vector.broadcast %192 : vector<8x1xf32> to vector<8x32xf32>
    %194 = arith.subf %184, %193 : vector<8x32xf32>
    %195 = arith.mulf %194, %194 : vector<8x32xf32>
    %cst_75 = arith.constant dense<0.000000e+00> : vector<8xf32>
    %196 = vector.multi_reduction <add>, %195, %cst_75 [1] : vector<8x32xf32> to vector<8xf32>
    %197 = vector.shape_cast %196 : vector<8xf32> to vector<8x1xf32>
    %cst_76 = arith.constant 3.200000e+01 : f32
    %198 = vector.broadcast %cst_76 : f32 to vector<8x1xf32>
    %199 = arith.divf %197, %198 : vector<8x1xf32>
    %200 = vector.broadcast %192 : vector<8x1xf32> to vector<8x32xf32>
    %201 = arith.subf %184, %200 : vector<8x32xf32>
    %cst_77 = arith.constant 9.99999974E-6 : f32
    %202 = vector.broadcast %cst_77 : f32 to vector<8x1xf32>
    %203 = arith.addf %199, %202 : vector<8x1xf32>
    %204 = math.rsqrt %203 : vector<8x1xf32>
    %205 = vector.broadcast %204 : vector<8x1xf32> to vector<8x32xf32>
    %206 = arith.mulf %201, %205 : vector<8x32xf32>
    %207 = vector.broadcast %186 : vector<1x32xf32> to vector<8x32xf32>
    %208 = arith.mulf %206, %207 : vector<8x32xf32>
    %209 = vector.broadcast %188 : vector<1x32xf32> to vector<8x32xf32>
    %210 = arith.addf %208, %209 : vector<8x32xf32>
    %c1_78 = arith.constant 1 : index
    %c0_79 = arith.constant 0 : index
    %c0_80 = arith.constant 0 : index
    %211 = vector.load %arg7[%c1_78, %c0_79, %c0_80] : memref<2x32x96xf32, #tpu.memory_space<vmem>>, vector<1x32x96xf32>
    %212 = vector.shape_cast %211 : vector<1x32x96xf32> to vector<32x96xf32>
    %cst_81 = arith.constant dense<0.000000e+00> : vector<8x96xf32>
    %213 = tpu.matmul %210, %212, %cst_81 {dimension_numbers = #tpu.dot_dimension_numbers<[1], [0], [0], [1], [0, 0, 1, 1], [], []>} : vector<8x32xf32>, vector<32x96xf32>, vector<8x96xf32> -> vector<8x96xf32>
    %c1_82 = arith.constant 1 : index
    %c0_83 = arith.constant 0 : index
    %c0_84 = arith.constant 0 : index
    %214 = vector.load %arg8[%c1_82, %c0_83, %c0_84] : memref<2x1x96xf32, #tpu.memory_space<vmem>>, vector<1x1x96xf32>
    %215 = vector.shape_cast %214 : vector<1x1x96xf32> to vector<1x96xf32>
    %216 = vector.broadcast %215 : vector<1x96xf32> to vector<8x96xf32>
    %217 = arith.addf %213, %216 : vector<8x96xf32>
    %218 = vector.extract_strided_slice %217 {offsets = [0, 0], sizes = [8, 32], strides = [1, 1]} : vector<8x96xf32> to vector<8x32xf32>
    %219 = vector.extract_strided_slice %218 {offsets = [0, 0], sizes = [8, 8], strides = [1, 1]} : vector<8x32xf32> to vector<8x8xf32>
    %220 = vector.shape_cast %219 : vector<8x8xf32> to vector<1x8x8xf32>
    %221 = vector.extract_strided_slice %218 {offsets = [0, 8], sizes = [8, 8], strides = [1, 1]} : vector<8x32xf32> to vector<8x8xf32>
    %222 = vector.shape_cast %221 : vector<8x8xf32> to vector<1x8x8xf32>
    %223 = vector.extract_strided_slice %218 {offsets = [0, 16], sizes = [8, 8], strides = [1, 1]} : vector<8x32xf32> to vector<8x8xf32>
    %224 = vector.shape_cast %223 : vector<8x8xf32> to vector<1x8x8xf32>
    %225 = vector.extract_strided_slice %218 {offsets = [0, 24], sizes = [8, 8], strides = [1, 1]} : vector<8x32xf32> to vector<8x8xf32>
    %226 = vector.shape_cast %225 : vector<8x8xf32> to vector<1x8x8xf32>
    %227 = vector.shape_cast %220 : vector<1x8x8xf32> to vector<1x1x8x8xf32>
    %228 = vector.shape_cast %222 : vector<1x8x8xf32> to vector<1x1x8x8xf32>
    %229 = vector.shape_cast %224 : vector<1x8x8xf32> to vector<1x1x8x8xf32>
    %230 = vector.shape_cast %226 : vector<1x8x8xf32> to vector<1x1x8x8xf32>
    %231 = tpu.concatenate %227, %228, %229, %230 in 0 : vector<1x1x8x8xf32>, vector<1x1x8x8xf32>, vector<1x1x8x8xf32>, vector<1x1x8x8xf32> -> vector<4x1x8x8xf32>
    %232 = vector.shape_cast %231 : vector<4x1x8x8xf32> to vector<4x8x8xf32>
    %233 = vector.extract_strided_slice %217 {offsets = [0, 32], sizes = [8, 32], strides = [1, 1]} : vector<8x96xf32> to vector<8x32xf32>
    %234 = vector.extract_strided_slice %233 {offsets = [0, 0], sizes = [8, 8], strides = [1, 1]} : vector<8x32xf32> to vector<8x8xf32>
    %235 = vector.shape_cast %234 : vector<8x8xf32> to vector<1x8x8xf32>
    %236 = vector.extract_strided_slice %233 {offsets = [0, 8], sizes = [8, 8], strides = [1, 1]} : vector<8x32xf32> to vector<8x8xf32>
    %237 = vector.shape_cast %236 : vector<8x8xf32> to vector<1x8x8xf32>
    %238 = vector.extract_strided_slice %233 {offsets = [0, 16], sizes = [8, 8], strides = [1, 1]} : vector<8x32xf32> to vector<8x8xf32>
    %239 = vector.shape_cast %238 : vector<8x8xf32> to vector<1x8x8xf32>
    %240 = vector.extract_strided_slice %233 {offsets = [0, 24], sizes = [8, 8], strides = [1, 1]} : vector<8x32xf32> to vector<8x8xf32>
    %241 = vector.shape_cast %240 : vector<8x8xf32> to vector<1x8x8xf32>
    %242 = vector.shape_cast %235 : vector<1x8x8xf32> to vector<1x1x8x8xf32>
    %243 = vector.shape_cast %237 : vector<1x8x8xf32> to vector<1x1x8x8xf32>
    %244 = vector.shape_cast %239 : vector<1x8x8xf32> to vector<1x1x8x8xf32>
    %245 = vector.shape_cast %241 : vector<1x8x8xf32> to vector<1x1x8x8xf32>
    %246 = tpu.concatenate %242, %243, %244, %245 in 0 : vector<1x1x8x8xf32>, vector<1x1x8x8xf32>, vector<1x1x8x8xf32>, vector<1x1x8x8xf32> -> vector<4x1x8x8xf32>
    %247 = vector.shape_cast %246 : vector<4x1x8x8xf32> to vector<4x8x8xf32>
    %248 = vector.extract_strided_slice %217 {offsets = [0, 64], sizes = [8, 32], strides = [1, 1]} : vector<8x96xf32> to vector<8x32xf32>
    %249 = vector.extract_strided_slice %248 {offsets = [0, 0], sizes = [8, 8], strides = [1, 1]} : vector<8x32xf32> to vector<8x8xf32>
    %250 = vector.shape_cast %249 : vector<8x8xf32> to vector<1x8x8xf32>
    %251 = vector.extract_strided_slice %248 {offsets = [0, 8], sizes = [8, 8], strides = [1, 1]} : vector<8x32xf32> to vector<8x8xf32>
    %252 = vector.shape_cast %251 : vector<8x8xf32> to vector<1x8x8xf32>
    %253 = vector.extract_strided_slice %248 {offsets = [0, 16], sizes = [8, 8], strides = [1, 1]} : vector<8x32xf32> to vector<8x8xf32>
    %254 = vector.shape_cast %253 : vector<8x8xf32> to vector<1x8x8xf32>
    %255 = vector.extract_strided_slice %248 {offsets = [0, 24], sizes = [8, 8], strides = [1, 1]} : vector<8x32xf32> to vector<8x8xf32>
    %256 = vector.shape_cast %255 : vector<8x8xf32> to vector<1x8x8xf32>
    %257 = vector.shape_cast %250 : vector<1x8x8xf32> to vector<1x1x8x8xf32>
    %258 = vector.shape_cast %252 : vector<1x8x8xf32> to vector<1x1x8x8xf32>
    %259 = vector.shape_cast %254 : vector<1x8x8xf32> to vector<1x1x8x8xf32>
    %260 = vector.shape_cast %256 : vector<1x8x8xf32> to vector<1x1x8x8xf32>
    %261 = tpu.concatenate %257, %258, %259, %260 in 0 : vector<1x1x8x8xf32>, vector<1x1x8x8xf32>, vector<1x1x8x8xf32>, vector<1x1x8x8xf32> -> vector<4x1x8x8xf32>
    %262 = vector.shape_cast %261 : vector<4x1x8x8xf32> to vector<4x8x8xf32>
    "tpu.trace_start"() <{level = 10 : i32, message = "bqd,bkd->bqk"}> : () -> ()
    %cst_85 = arith.constant dense<0.000000e+00> : vector<4x8x8xf32>
    %263 = tpu.matmul %232, %247, %cst_85 {dimension_numbers = #tpu.dot_dimension_numbers<[2], [2], [1], [1], [0, 0, 0, 1, 1, 1], [0], [0]>} : vector<4x8x8xf32>, vector<4x8x8xf32>, vector<4x8x8xf32> -> vector<4x8x8xf32>
    "tpu.trace_stop"() : () -> ()
    %cst_86 = arith.constant 0.353553385 : f32
    %264 = vector.broadcast %cst_86 : f32 to vector<4x8x8xf32>
    %265 = arith.mulf %263, %264 : vector<4x8x8xf32>
    %cst_87 = arith.constant -1.000000e+30 : f32
    %266 = vector.shape_cast %15 : vector<1x8x8xi1> to vector<1x8x8xi1>
    %267 = vector.broadcast %266 : vector<1x8x8xi1> to vector<4x8x8xi1>
    %268 = vector.broadcast %cst_87 : f32 to vector<4x8x8xf32>
    %269 = arith.select %267, %265, %268 : vector<4x8x8xi1>, vector<4x8x8xf32>
    %cst_88 = arith.constant dense<0xFF800000> : vector<4x8xf32>
    %270 = vector.multi_reduction <maximumf>, %269, %cst_88 [2] : vector<4x8x8xf32> to vector<4x8xf32>
    %271 = vector.shape_cast %270 : vector<4x8xf32> to vector<4x8x1xf32>
    %272 = vector.broadcast %271 : vector<4x8x1xf32> to vector<4x8x8xf32>
    %273 = arith.subf %269, %272 : vector<4x8x8xf32>
    %274 = math.exp %273 : vector<4x8x8xf32>
    %cst_89 = arith.constant dense<0.000000e+00> : vector<4x8xf32>
    %275 = vector.multi_reduction <add>, %274, %cst_89 [2] : vector<4x8x8xf32> to vector<4x8xf32>
    %276 = vector.shape_cast %275 : vector<4x8xf32> to vector<4x8x1xf32>
    %277 = tpu.reciprocal %276 {approx = true} : vector<4x8x1xf32> -> vector<4x8x1xf32>
    %278 = vector.broadcast %277 : vector<4x8x1xf32> to vector<4x8x8xf32>
    %279 = arith.mulf %274, %278 : vector<4x8x8xf32>
    "tpu.trace_start"() <{level = 10 : i32, message = "bqk,bkd->bqd"}> : () -> ()
    %cst_90 = arith.constant dense<0.000000e+00> : vector<4x8x8xf32>
    %280 = tpu.matmul %279, %262, %cst_90 {dimension_numbers = #tpu.dot_dimension_numbers<[2], [1], [1], [2], [0, 0, 0, 1, 1, 2], [0], [0]>} : vector<4x8x8xf32>, vector<4x8x8xf32>, vector<4x8x8xf32> -> vector<4x8x8xf32>
    "tpu.trace_stop"() : () -> ()
    %281 = vector.shape_cast %280 : vector<4x8x8xf32> to vector<4x1x8x8xf32>
    %282 = vector.extract_strided_slice %281 {offsets = [0, 0, 0, 0], sizes = [1, 1, 8, 8], strides = [1, 1, 1, 1]} : vector<4x1x8x8xf32> to vector<1x1x8x8xf32>
    %283 = vector.shape_cast %282 : vector<1x1x8x8xf32> to vector<1x8x8xf32>
    %284 = vector.extract_strided_slice %281 {offsets = [1, 0, 0, 0], sizes = [1, 1, 8, 8], strides = [1, 1, 1, 1]} : vector<4x1x8x8xf32> to vector<1x1x8x8xf32>
    %285 = vector.shape_cast %284 : vector<1x1x8x8xf32> to vector<1x8x8xf32>
    %286 = vector.extract_strided_slice %281 {offsets = [2, 0, 0, 0], sizes = [1, 1, 8, 8], strides = [1, 1, 1, 1]} : vector<4x1x8x8xf32> to vector<1x1x8x8xf32>
    %287 = vector.shape_cast %286 : vector<1x1x8x8xf32> to vector<1x8x8xf32>
    %288 = vector.extract_strided_slice %281 {offsets = [3, 0, 0, 0], sizes = [1, 1, 8, 8], strides = [1, 1, 1, 1]} : vector<4x1x8x8xf32> to vector<1x1x8x8xf32>
    %289 = vector.shape_cast %288 : vector<1x1x8x8xf32> to vector<1x8x8xf32>
    %290 = tpu.concatenate %283, %285, %287, %289 in 2 : vector<1x8x8xf32>, vector<1x8x8xf32>, vector<1x8x8xf32>, vector<1x8x8xf32> -> vector<1x8x32xf32>
    %291 = vector.shape_cast %290 : vector<1x8x32xf32> to vector<8x32xf32>
    %c1_91 = arith.constant 1 : index
    %c0_92 = arith.constant 0 : index
    %c0_93 = arith.constant 0 : index
    %292 = vector.load %arg9[%c1_91, %c0_92, %c0_93] : memref<2x32x32xf32, #tpu.memory_space<vmem>>, vector<1x32x32xf32>
    %293 = vector.shape_cast %292 : vector<1x32x32xf32> to vector<32x32xf32>
    %cst_94 = arith.constant dense<0.000000e+00> : vector<8x32xf32>
    %294 = tpu.matmul %291, %293, %cst_94 {dimension_numbers = #tpu.dot_dimension_numbers<[1], [0], [0], [1], [0, 0, 1, 1], [], []>} : vector<8x32xf32>, vector<32x32xf32>, vector<8x32xf32> -> vector<8x32xf32>
    %295 = arith.addf %184, %294 : vector<8x32xf32>
    %c1_95 = arith.constant 1 : index
    %c0_96 = arith.constant 0 : index
    %c0_97 = arith.constant 0 : index
    %296 = vector.load %arg10[%c1_95, %c0_96, %c0_97] : memref<2x1x32xf32, #tpu.memory_space<vmem>>, vector<1x1x32xf32>
    %297 = vector.shape_cast %296 : vector<1x1x32xf32> to vector<1x32xf32>
    %298 = vector.broadcast %297 : vector<1x32xf32> to vector<8x32xf32>
    %299 = arith.addf %295, %298 : vector<8x32xf32>
    %c1_98 = arith.constant 1 : index
    %c0_99 = arith.constant 0 : index
    %c0_100 = arith.constant 0 : index
    %300 = vector.load %arg11[%c1_98, %c0_99, %c0_100] : memref<2x1x32xf32, #tpu.memory_space<vmem>>, vector<1x1x32xf32>
    %301 = vector.shape_cast %300 : vector<1x1x32xf32> to vector<1x32xf32>
    %c1_101 = arith.constant 1 : index
    %c0_102 = arith.constant 0 : index
    %c0_103 = arith.constant 0 : index
    %302 = vector.load %arg12[%c1_101, %c0_102, %c0_103] : memref<2x1x32xf32, #tpu.memory_space<vmem>>, vector<1x1x32xf32>
    %303 = vector.shape_cast %302 : vector<1x1x32xf32> to vector<1x32xf32>
    %cst_104 = arith.constant dense<0.000000e+00> : vector<8xf32>
    %304 = vector.multi_reduction <add>, %299, %cst_104 [1] : vector<8x32xf32> to vector<8xf32>
    %305 = vector.shape_cast %304 : vector<8xf32> to vector<8x1xf32>
    %cst_105 = arith.constant 3.200000e+01 : f32
    %306 = vector.broadcast %cst_105 : f32 to vector<8x1xf32>
    %307 = arith.divf %305, %306 : vector<8x1xf32>
    %308 = vector.broadcast %307 : vector<8x1xf32> to vector<8x32xf32>
    %309 = arith.subf %299, %308 : vector<8x32xf32>
    %310 = arith.mulf %309, %309 : vector<8x32xf32>
    %cst_106 = arith.constant dense<0.000000e+00> : vector<8xf32>
    %311 = vector.multi_reduction <add>, %310, %cst_106 [1] : vector<8x32xf32> to vector<8xf32>
    %312 = vector.shape_cast %311 : vector<8xf32> to vector<8x1xf32>
    %cst_107 = arith.constant 3.200000e+01 : f32
    %313 = vector.broadcast %cst_107 : f32 to vector<8x1xf32>
    %314 = arith.divf %312, %313 : vector<8x1xf32>
    %315 = vector.broadcast %307 : vector<8x1xf32> to vector<8x32xf32>
    %316 = arith.subf %299, %315 : vector<8x32xf32>
    %cst_108 = arith.constant 9.99999974E-6 : f32
    %317 = vector.broadcast %cst_108 : f32 to vector<8x1xf32>
    %318 = arith.addf %314, %317 : vector<8x1xf32>
    %319 = math.rsqrt %318 : vector<8x1xf32>
    %320 = vector.broadcast %319 : vector<8x1xf32> to vector<8x32xf32>
    %321 = arith.mulf %316, %320 : vector<8x32xf32>
    %322 = vector.broadcast %301 : vector<1x32xf32> to vector<8x32xf32>
    %323 = arith.mulf %321, %322 : vector<8x32xf32>
    %324 = vector.broadcast %303 : vector<1x32xf32> to vector<8x32xf32>
    %325 = arith.addf %323, %324 : vector<8x32xf32>
    %c1_109 = arith.constant 1 : index
    %c0_110 = arith.constant 0 : index
    %c0_111 = arith.constant 0 : index
    %326 = vector.load %arg13[%c1_109, %c0_110, %c0_111] : memref<2x32x128xf32, #tpu.memory_space<vmem>>, vector<1x32x128xf32>
    %327 = vector.shape_cast %326 : vector<1x32x128xf32> to vector<32x128xf32>
    %cst_112 = arith.constant dense<0.000000e+00> : vector<8x128xf32>
    %328 = tpu.matmul %325, %327, %cst_112 {dimension_numbers = #tpu.dot_dimension_numbers<[1], [0], [0], [1], [0, 0, 1, 1], [], []>} : vector<8x32xf32>, vector<32x128xf32>, vector<8x128xf32> -> vector<8x128xf32>
    %c1_113 = arith.constant 1 : index
    %c0_114 = arith.constant 0 : index
    %c0_115 = arith.constant 0 : index
    %329 = vector.load %arg14[%c1_113, %c0_114, %c0_115] : memref<2x1x128xf32, #tpu.memory_space<vmem>>, vector<1x1x128xf32>
    %330 = vector.shape_cast %329 : vector<1x1x128xf32> to vector<1x128xf32>
    %331 = vector.broadcast %330 : vector<1x128xf32> to vector<8x128xf32>
    %332 = arith.addf %328, %331 : vector<8x128xf32>
    %cst_116 = arith.constant 5.000000e-01 : f32
    %333 = vector.broadcast %cst_116 : f32 to vector<8x128xf32>
    %334 = arith.mulf %333, %332 : vector<8x128xf32>
    %cst_117 = arith.constant 4.471500e-02 : f32
    %335 = vector.broadcast %cst_117 : f32 to vector<8x128xf32>
    %336 = arith.mulf %335, %332 : vector<8x128xf32>
    %337 = arith.mulf %336, %332 : vector<8x128xf32>
    %338 = arith.mulf %337, %332 : vector<8x128xf32>
    %339 = arith.addf %332, %338 : vector<8x128xf32>
    %cst_118 = arith.constant 0.797884583 : f32
    %340 = vector.broadcast %cst_118 : f32 to vector<8x128xf32>
    %341 = arith.mulf %340, %339 : vector<8x128xf32>
    %342 = math.tanh %341 : vector<8x128xf32>
    %cst_119 = arith.constant 1.000000e+00 : f32
    %343 = vector.broadcast %cst_119 : f32 to vector<8x128xf32>
    %344 = arith.addf %343, %342 : vector<8x128xf32>
    %345 = arith.mulf %334, %344 : vector<8x128xf32>
    %c1_120 = arith.constant 1 : index
    %c0_121 = arith.constant 0 : index
    %c0_122 = arith.constant 0 : index
    %346 = vector.load %arg15[%c1_120, %c0_121, %c0_122] : memref<2x128x32xf32, #tpu.memory_space<vmem>>, vector<1x128x32xf32>
    %347 = vector.shape_cast %346 : vector<1x128x32xf32> to vector<128x32xf32>
    %cst_123 = arith.constant dense<0.000000e+00> : vector<8x32xf32>
    %348 = tpu.matmul %345, %347, %cst_123 {dimension_numbers = #tpu.dot_dimension_numbers<[1], [0], [0], [1], [0, 0, 1, 1], [], []>} : vector<8x128xf32>, vector<128x32xf32>, vector<8x32xf32> -> vector<8x32xf32>
    %349 = arith.addf %299, %348 : vector<8x32xf32>
    %c1_124 = arith.constant 1 : index
    %c0_125 = arith.constant 0 : index
    %c0_126 = arith.constant 0 : index
    %350 = vector.load %arg16[%c1_124, %c0_125, %c0_126] : memref<2x1x32xf32, #tpu.memory_space<vmem>>, vector<1x1x32xf32>
    %351 = vector.shape_cast %350 : vector<1x1x32xf32> to vector<1x32xf32>
    %352 = vector.broadcast %351 : vector<1x32xf32> to vector<8x32xf32>
    %353 = arith.addf %349, %352 : vector<8x32xf32>
    %c0_127 = arith.constant 0 : index
    %c0_128 = arith.constant 0 : index
    %354 = vector.load %arg17[%c0_127, %c0_128] : memref<1x32xf32, #tpu.memory_space<vmem>>, vector<1x32xf32>
    %c0_129 = arith.constant 0 : index
    %c0_130 = arith.constant 0 : index
    %355 = vector.load %arg18[%c0_129, %c0_130] : memref<1x32xf32, #tpu.memory_space<vmem>>, vector<1x32xf32>
    %cst_131 = arith.constant dense<0.000000e+00> : vector<8xf32>
    %356 = vector.multi_reduction <add>, %353, %cst_131 [1] : vector<8x32xf32> to vector<8xf32>
    %357 = vector.shape_cast %356 : vector<8xf32> to vector<8x1xf32>
    %cst_132 = arith.constant 3.200000e+01 : f32
    %358 = vector.broadcast %cst_132 : f32 to vector<8x1xf32>
    %359 = arith.divf %357, %358 : vector<8x1xf32>
    %360 = vector.broadcast %359 : vector<8x1xf32> to vector<8x32xf32>
    %361 = arith.subf %353, %360 : vector<8x32xf32>
    %362 = arith.mulf %361, %361 : vector<8x32xf32>
    %cst_133 = arith.constant dense<0.000000e+00> : vector<8xf32>
    %363 = vector.multi_reduction <add>, %362, %cst_133 [1] : vector<8x32xf32> to vector<8xf32>
    %364 = vector.shape_cast %363 : vector<8xf32> to vector<8x1xf32>
    %cst_134 = arith.constant 3.200000e+01 : f32
    %365 = vector.broadcast %cst_134 : f32 to vector<8x1xf32>
    %366 = arith.divf %364, %365 : vector<8x1xf32>
    %367 = vector.broadcast %359 : vector<8x1xf32> to vector<8x32xf32>
    %368 = arith.subf %353, %367 : vector<8x32xf32>
    %cst_135 = arith.constant 9.99999974E-6 : f32
    %369 = vector.broadcast %cst_135 : f32 to vector<8x1xf32>
    %370 = arith.addf %366, %369 : vector<8x1xf32>
    %371 = math.rsqrt %370 : vector<8x1xf32>
    %372 = vector.broadcast %371 : vector<8x1xf32> to vector<8x32xf32>
    %373 = arith.mulf %368, %372 : vector<8x32xf32>
    %374 = vector.broadcast %354 : vector<1x32xf32> to vector<8x32xf32>
    %375 = arith.mulf %373, %374 : vector<8x32xf32>
    %376 = vector.broadcast %355 : vector<1x32xf32> to vector<8x32xf32>
    %377 = arith.addf %375, %376 : vector<8x32xf32>
    %c0_136 = arith.constant 0 : index
    %c0_137 = arith.constant 0 : index
    %378 = vector.load %arg19[%c0_136, %c0_137] : memref<32x1xf32, #tpu.memory_space<vmem>>, vector<32x1xf32>
    %cst_138 = arith.constant dense<0.000000e+00> : vector<8x1xf32>
    %379 = tpu.matmul %377, %378, %cst_138 {dimension_numbers = #tpu.dot_dimension_numbers<[1], [0], [0], [1], [0, 0, 1, 1], [], []>} : vector<8x32xf32>, vector<32x1xf32>, vector<8x1xf32> -> vector<8x1xf32>
    %c0_139 = arith.constant 0 : index
    %c0_140 = arith.constant 0 : index
    %380 = vector.load %arg20[%c0_139, %c0_140] : memref<1x1xf32, #tpu.memory_space<vmem>>, vector<1x1xf32>
    %381 = vector.broadcast %380 : vector<1x1xf32> to vector<8x1xf32>
    %382 = arith.addf %379, %381 : vector<8x1xf32>
    %383 = vector.shape_cast %382 : vector<8x1xf32> to vector<1x8x1xf32>
    %c0_141 = arith.constant 0 : index
    %c0_142 = arith.constant 0 : index
    %c0_143 = arith.constant 0 : index
    %384 = vector.load %arg21[%c0_141, %c0_142, %c0_143] : memref<1x8x1xf32, #tpu.memory_space<vmem>>, vector<1x8x1xf32>
    tpu.vector_store %arg21[%c0_141, %c0_142, %c0_143], %383 {strides = array<i32>} : memref<1x8x1xf32, #tpu.memory_space<vmem>>, vector<1x8x1xf32>,
    return
  }
  func.func @transform_0(%arg0: i32) -> (i32, i32, i32) {
    %c0_i32 = arith.constant 0 : i32
    %c0_i32_0 = arith.constant 0 : i32
    %c0_i32_1 = arith.constant 0 : i32
    return %arg0, %c0_i32, %c0_i32_0 : i32, i32, i32
  }
  func.func @transform_1(%arg0: i32) -> (i32, i32) {
    %c0_i32 = arith.constant 0 : i32
    %c0_i32_0 = arith.constant 0 : i32
    %c0_i32_1 = arith.constant 0 : i32
    return %c0_i32, %c0_i32_0 : i32, i32
  }
  func.func @transform_2(%arg0: i32) -> (i32, i32) {
    %c0_i32 = arith.constant 0 : i32
    %c0_i32_0 = arith.constant 0 : i32
    %c0_i32_1 = arith.constant 0 : i32
    return %c0_i32, %c0_i32_0 : i32, i32
  }
  func.func @transform_3(%arg0: i32) -> (i32, i32) {
    %c0_i32 = arith.constant 0 : i32
    %c0_i32_0 = arith.constant 0 : i32
    %c0_i32_1 = arith.constant 0 : i32
    return %c0_i32, %c0_i32_0 : i32, i32
  }
  func.func @transform_4(%arg0: i32) -> (i32, i32, i32) {
    %c0_i32 = arith.constant 0 : i32
    %c0_i32_0 = arith.constant 0 : i32
    %c0_i32_1 = arith.constant 0 : i32
    %c0_i32_2 = arith.constant 0 : i32
    return %c0_i32, %c0_i32_0, %c0_i32_1 : i32, i32, i32
  }
  func.func @transform_5(%arg0: i32) -> (i32, i32, i32) {
    %c0_i32 = arith.constant 0 : i32
    %c0_i32_0 = arith.constant 0 : i32
    %c0_i32_1 = arith.constant 0 : i32
    %c0_i32_2 = arith.constant 0 : i32
    return %c0_i32, %c0_i32_0, %c0_i32_1 : i32, i32, i32
  }
  func.func @transform_6(%arg0: i32) -> (i32, i32, i32) {
    %c0_i32 = arith.constant 0 : i32
    %c0_i32_0 = arith.constant 0 : i32
    %c0_i32_1 = arith.constant 0 : i32
    %c0_i32_2 = arith.constant 0 : i32
    return %c0_i32, %c0_i32_0, %c0_i32_1 : i32, i32, i32
  }
  func.func @transform_7(%arg0: i32) -> (i32, i32, i32) {
    %c0_i32 = arith.constant 0 : i32
    %c0_i32_0 = arith.constant 0 : i32
    %c0_i32_1 = arith.constant 0 : i32
    %c0_i32_2 = arith.constant 0 : i32
    return %c0_i32, %c0_i32_0, %c0_i32_1 : i32, i32, i32
  }
  func.func @transform_8(%arg0: i32) -> (i32, i32, i32) {
    %c0_i32 = arith.constant 0 : i32
    %c0_i32_0 = arith.constant 0 : i32
    %c0_i32_1 = arith.constant 0 : i32
    %c0_i32_2 = arith.constant 0 : i32
    return %c0_i32, %c0_i32_0, %c0_i32_1 : i32, i32, i32
  }
  func.func @transform_9(%arg0: i32) -> (i32, i32, i32) {
    %c0_i32 = arith.constant 0 : i32
    %c0_i32_0 = arith.constant 0 : i32
    %c0_i32_1 = arith.constant 0 : i32
    %c0_i32_2 = arith.constant 0 : i32
    return %c0_i32, %c0_i32_0, %c0_i32_1 : i32, i32, i32
  }
  func.func @transform_10(%arg0: i32) -> (i32, i32, i32) {
    %c0_i32 = arith.constant 0 : i32
    %c0_i32_0 = arith.constant 0 : i32
    %c0_i32_1 = arith.constant 0 : i32
    %c0_i32_2 = arith.constant 0 : i32
    return %c0_i32, %c0_i32_0, %c0_i32_1 : i32, i32, i32
  }
  func.func @transform_11(%arg0: i32) -> (i32, i32, i32) {
    %c0_i32 = arith.constant 0 : i32
    %c0_i32_0 = arith.constant 0 : i32
    %c0_i32_1 = arith.constant 0 : i32
    %c0_i32_2 = arith.constant 0 : i32
    return %c0_i32, %c0_i32_0, %c0_i32_1 : i32, i32, i32
  }
  func.func @transform_12(%arg0: i32) -> (i32, i32, i32) {
    %c0_i32 = arith.constant 0 : i32
    %c0_i32_0 = arith.constant 0 : i32
    %c0_i32_1 = arith.constant 0 : i32
    %c0_i32_2 = arith.constant 0 : i32
    return %c0_i32, %c0_i32_0, %c0_i32_1 : i32, i32, i32
  }
  func.func @transform_13(%arg0: i32) -> (i32, i32, i32) {
    %c0_i32 = arith.constant 0 : i32
    %c0_i32_0 = arith.constant 0 : i32
    %c0_i32_1 = arith.constant 0 : i32
    %c0_i32_2 = arith.constant 0 : i32
    return %c0_i32, %c0_i32_0, %c0_i32_1 : i32, i32, i32
  }
  func.func @transform_14(%arg0: i32) -> (i32, i32, i32) {
    %c0_i32 = arith.constant 0 : i32
    %c0_i32_0 = arith.constant 0 : i32
    %c0_i32_1 = arith.constant 0 : i32
    %c0_i32_2 = arith.constant 0 : i32
    return %c0_i32, %c0_i32_0, %c0_i32_1 : i32, i32, i32
  }
  func.func @transform_15(%arg0: i32) -> (i32, i32, i32) {
    %c0_i32 = arith.constant 0 : i32
    %c0_i32_0 = arith.constant 0 : i32
    %c0_i32_1 = arith.constant 0 : i32
    %c0_i32_2 = arith.constant 0 : i32
    return %c0_i32, %c0_i32_0, %c0_i32_1 : i32, i32, i32
  }
  func.func @transform_16(%arg0: i32) -> (i32, i32) {
    %c0_i32 = arith.constant 0 : i32
    %c0_i32_0 = arith.constant 0 : i32
    %c0_i32_1 = arith.constant 0 : i32
    return %c0_i32, %c0_i32_0 : i32, i32
  }
  func.func @transform_17(%arg0: i32) -> (i32, i32) {
    %c0_i32 = arith.constant 0 : i32
    %c0_i32_0 = arith.constant 0 : i32
    %c0_i32_1 = arith.constant 0 : i32
    return %c0_i32, %c0_i32_0 : i32, i32
  }
  func.func @transform_18(%arg0: i32) -> (i32, i32) {
    %c0_i32 = arith.constant 0 : i32
    %c0_i32_0 = arith.constant 0 : i32
    %c0_i32_1 = arith.constant 0 : i32
    return %c0_i32, %c0_i32_0 : i32, i32
  }
  func.func @transform_19(%arg0: i32) -> (i32, i32) {
    %c0_i32 = arith.constant 0 : i32
    %c0_i32_0 = arith.constant 0 : i32
    %c0_i32_1 = arith.constant 0 : i32
    return %c0_i32, %c0_i32_0 : i32, i32
  }
  func.func @transform_20(%arg0: i32) -> (i32, i32, i32) {
    %c0_i32 = arith.constant 0 : i32
    %c0_i32_0 = arith.constant 0 : i32
    %c0_i32_1 = arith.constant 0 : i32
    return %arg0, %c0_i32, %c0_i32_0 : i32, i32, i32
  }
}

</mosaic_0001>

<bundles_post_ra>
// kernel: gpt_forward_pallas.1
= control target key start
LH: loop header
LB: loop body
LE: loop exit
PB: predicated region body
PF: predicated region fallthrough
CT: control target
= control target key end

     0   :  { %s3727_s23 = smov 0   ;;  %s4292_s0 = inlined_call_operand.vmem [shape: f32[2,8,4], index: 0, kind: input, shape index: {}]   ;;  %s4293_s1 = inlined_call_operand.vmem [shape: f32[4,32], index: 1, kind: input, shape index: {}]   ;;  %s4294_s2 = inlined_call_operand.vmem [shape: f32[1,32], index: 2, kind: input, shape index: {}]   ;;  %s4295_s3 = inlined_call_operand.vmem [shape: f32[16,32], index: 3, kind: input, shape index: {}]   ;;  %s4296_s4 = inlined_call_operand.vmem [shape: f32[2,1,32], index: 4, kind: input, shape index: {}]   ;;  %s4297_s5 = inlined_call_operand.vmem [shape: f32[2,1,32], index: 5, kind: input, shape index: {}]   ;;  %s4298_s6 = inlined_call_operand.vmem [shape: f32[2,32,96], index: 6, kind: input, shape index: {}]   ;;  %s4299_s7 = inlined_call_operand.vmem [shape: f32[2,1,96], index: 7, kind: input, shape index: {}]   ;;  %s4300_s8 = inlined_call_operand.vmem [shape: f32[2,32,32], index: 8, kind: input, shape index: {}]   ;;  %s4301_s9 = inlined_call_operand.vmem [shape: f32[2,1,32], index: 9, kind: input, shape index: {}]   ;;  %s4302_s10 = inlined_call_operand.vmem [shape: f32[2,1,32], index: 10, kind: input, shape index: {}]   ;;  %s4303_s11 = inlined_call_operand.vmem [shape: f32[2,1,32], index: 11, kind: input, shape index: {}]   ;;  %s4304_s12 = inlined_call_operand.vmem [shape: f32[2,32,128], index: 12, kind: input, shape index: {}]   ;;  %s4305_s13 = inlined_call_operand.vmem [shape: f32[2,1,128], index: 13, kind: input, shape index: {}]   ;;  %s4306_s14 = inlined_call_operand.vmem [shape: f32[2,128,32], index: 14, kind: input, shape index: {}]   ;;  %s4307_s15 = inlined_call_operand.vmem [shape: f32[2,1,32], index: 15, kind: input, shape index: {}]   ;;  %s4308_s16 = inlined_call_operand.vmem [shape: f32[1,32], index: 16, kind: input, shape index: {}]   ;;  %s4309_s17 = inlined_call_operand.vmem [shape: f32[1,32], index: 17, kind: input, shape index: {}]   ;;  %s4310_s18 = inlined_call_operand.vmem [shape: f32[32,1], index: 18, kind: input, shape index: {}]   ;;  %s4311_s19 = inlined_call_operand.<no memory space> [shape: f32[1,1], index: 19, kind: input, shape index: {}]   ;;  %s4312_s20 = inlined_call_operand.vmem [shape: f32[2,8,1], index: 20, kind: output, shape index: {}]  }
   0x1   :  { %4318 = sst [smem:[#allocation3_spill]] %s4292_s0  ;;  %v25_v0 = vstv %s4311_s19 }
   0x2   :  { %4319 = sst [smem:[#allocation4_spill]] %s4293_s1  ;;  %26 = vst [vmem:[#allocation2] sm:$0x1] %v25_v0 }
   0x3   :  { %4320 = sst [smem:[#allocation5_spill]] %s4294_s2 }
   0x4   :  { %4321 = sst [smem:[#allocation6_spill]] %s4295_s3 }
   0x5   :  { %4322 = sst [smem:[#allocation7_spill]] %s4296_s4 }
   0x6 LB: > { %s3104_s24 = sadd.s32 4294967295, %s3607_s23   ;;  %p3108_p0 = scmp.ge.s32.totalorder %s3607_s23, 1  ;;  %s3607_s23 = sphi %s3727_s23, %s32_s23  }
   0x7   : > { %p563_p1 = scmp.lt.s32.totalorder %s3607_s23, 3 }
   0x9   : > { %p564_p2 = pnand %p3108_p0, %p563_p1 }
   0xa   : > { %s4323_s3 = sld [smem:[#allocation4_spill]] (!%p564_p2)  ;;  %p619_p3 = scmp.lt.s32.totalorder (!%p564_p2), %s3104_s24, 1 }
   0xb   : > { %567 = sbr.rel (%p564_p2) target bundleno = 5693 (0x163d), region = 100  ;;  %s4324_s28 = sld [smem:[#allocation3_spill]] (!%p564_p2) }
   0xc   : > { %s4325_s0 = sld [smem:[#allocation5_spill]] (!%p564_p2)  ;;  %s3612_s26 = smov (!%p564_p2), 120  }
   0xd   : > { %s4326_s22 = sld [smem:[#allocation6_spill]] (!%p564_p2)  ;;  %s3613_s27 = smov (!%p564_p2), 112  }
   0xe   : > { %s4327_s21 = sld [smem:[#allocation7_spill]] (!%p564_p2)  ;;  %s4317_s30 = smov (!%p564_p2), 8  }
   0xf   : > { %s4315_s1 = smov (!%p564_p2), 24   ;;  %s4331_s25 = smov (!%p564_p2), 16  }
  0x10   : > { %v628_v1 = vld [vmem:[%s4323_s3] sm:$0xf]  ;;  %vm640_vm0 = vcmask 1043456   ;;  %v3609_v2 = vmov 0.0   ;;  %vm3610_vm1 = vmmov 0   ;;  %s4335_s24 = smov (!%p619_p3, %s3104_s24), 1  ;;  %v716_v40 = vlaneseq }
  0x11   : > { %3305 = vmatprep.subr.mxu0 %v3609_v2  ;;  %3307 = vmatprep.mubr.msk.f32.mxu0 %vm3610_vm1, %v3609_v2  ;;  %s4314_s19 = sshll.u32 %s4335_s24, 3  ;;  %vm636_vm2 = vcmask 31744   ;;  %vm723_vm3 = vcmask 261120   ;;  %v755_v16 = vld [vmem:[%s4298_s6 + $0x18] sm:$0xff]  ;;  %v754_v17 = vld [vmem:[%s4298_s6 + $0x10] sm:$0xff]  ;;  %v753_v18 = vld [vmem:[%s4298_s6 + $0x8] sm:$0xff] }
  0x12   : > { %3306 = vmatpush3.msk.msra.mxu0 %vm640_vm0, %v628_v1  ;;  %3341 = vmatprep.subr.mxu1 %v3609_v2  ;;  %s622_s4 = scalar_lea.vmem %s4324_s28, %s4314_s19  ;;  %v3111_v4 = vld [vmem:[%s4325_s0] ss:$0 sm:$0xff]  ;;  %s3611_s3 = smov 104   ;;  %vm845_vm4 = vcmask 64512   ;;  %v717_v41 = vshrl.u32 %v716_v40, 7  ;;  %v719_v42 = vand.u32 127, %v716_v40 }
  0x13   : > { %3310 = vmatprep.subr.mxu0 %v3609_v2  ;;  %3343 = vmatprep.mubr.msk.f32.mxu1 %vm3610_vm1, %v3609_v2  ;;  %v627_v3 = vld [vmem:[%s622_s4] sm:$0xff]  ;;  %s3614_s28 = smov 96   ;;  %s3615_s4 = smov 64   ;;  %v1526_v40 = vld [vmem:[%s4300_s8 + $0x18] sm:$0xff]  ;;  %vm1519_vm6 = vcmask 130048   ;;  %vm1521_vm7 = vcmask 195584  }
  0x14   : > { %3308 = vmatmul.mubr.msk.f32.vlgmr.msra.gmra.mxu0 %vm636_vm2, %v627_v3  ;;  %v714_v6 = vld [vmem:[%s4326_s22] sm:$0xff]  ;;  %vm3841_vm5 = vcmp.le.s32.totalorder %v719_v42, %v717_v41  ;;  %v1525_v41 = vld [vmem:[%s4300_s8 + $0x10] sm:$0xff]  ;;  %v1524_v42 = vld [vmem:[%s4300_s8 + $0x8] sm:$0xff]  ;;  %s4316_s0 = smov 16   ;;  %s4332_s29 = smov 24   ;;  %vm3049_vm8 = vcmask 7168  }
  0x15   : > { %3318 = vmatprep.mubr.msk.f32.mxu0 %vm3610_vm1, %v3609_v2  ;;  %3311 = vmatpush3.msra.mxu0 %v755_v16  ;;  %v752_v19 = vld [vmem:[%s4298_s6] sm:$0xff] }
  0x16   : > { %3312 = vmatprep.subr.mxu0 %v3609_v2  ;;  %v3114_v24 = vld [vmem:[%s4327_s21] ss:$0 sm:$0xff] }
  0x17   : > { %3313 = vmatpush3.msra.mxu0 %v754_v17  ;;  %v3115_v26 = vld [vmem:[%s4297_s5] ss:$0 sm:$0xff] }
  0x18   : > { %3314 = vmatprep.subr.mxu0 %v3609_v2  ;;  %v3116_v29 = vld [vmem:[%s4299_s7] ss:$0 sm:$0xff] }
  0x19   : > { %3315 = vmatpush3.msra.mxu0 %v753_v18 }
  0x1a   : > { %3316 = vmatprep.subr.mxu0 %v3609_v2 }
  0x1b   : > { %3317 = vmatpush3.msra.mxu0 %v752_v19 }
  0x1c   : > { %3321 = vmatprep.subr.mxu0 %v3609_v2 }
  0xd4   : > { %v710_v5 = vpop.f32.mrf.mxu0 }
  0xd5   : > { %v711_v7 = vadd.f32 %v3111_v4, %v710_v5 }
  0xd6   : > { %v3309_v8 = vpop.f32.mrf.mxu0 }
  0xd7   : > { %v3761_v9 = vadd.f32 %v714_v6, %v711_v7 }
  0xd9   : > { %v724_v10 = vsel %vm723_vm3, %v3761_v9, 0.0 }
  0xda   : > { %725 = vadd.xlane.f32.xlu0 %v724_v10 }
 0x163   : > { %v726_v11 = vpop.xlane.xlu0 %725 }
 0x164   : > { %v728_v12 = vmul.f32 0.03125, %v726_v11 }
 0x166   : > { %v729_v13 = vsub.f32 %v3761_v9, %v728_v12 }
 0x168   : > { %v730_v14 = vmul.f32 %v729_v13, %v729_v13 }
 0x16a   : > { %v731_v15 = vsel %vm723_vm3, %v730_v14, 0.0 }
 0x16b   : > { %732 = vadd.xlane.f32.xlu0 %v731_v15 }
 0x1f4   : > { %v733_v20 = vpop.xlane.xlu0 %732 }
 0x1f5   : > { %v734_v21 = vmul.f32 0.03125, %v733_v20 }
 0x1f7   : > { %v735_v22 = vadd.f32 1e-05, %v734_v21 }
 0x1f9   : > { %3555 = vrsqrt.f32 %v735_v22 }
 0x206   : > { %v3556_v23 = vpop.eup %3555 }
 0x207   : > { %v737_v25 = vmul.f32 %v3556_v23, %v729_v13 }
 0x209   : > { %v744_v27 = vmul.f32 %v3114_v24, %v737_v25 }
 0x20b   : > { %v751_v28 = vadd.f32 %v3115_v26, %v744_v27 }
 0x20d   : > { %3319 = vmatmul.mubr.msk.f32.vlgmr.msra.gmra.mxu0 %vm723_vm3, %v751_v28 }
 0x20e   : > { %3323 = vmatprep.mubr.msk.f32.mxu0 %vm3610_vm1, %v3609_v2 }
 0x2cd   : > { %v832_v30 = vpop.f32.mrf.mxu0 }
 0x2ce   : > { %v3795_v31 = vadd.f32 %v3116_v29, %v832_v30 }
 0x2cf   : > { %v3320_v32 = vpop.f32.mrf.mxu0 }
 0x2d0   : > { %841 = vrot.lane.b32.xlu0 %v3795_v31, %s3611_s3  ;;  %837 = vrot.lane.b32.xlu1 %v3795_v31, %s3612_s26 }
 0x2d4   : > { %839 = vrot.lane.b32.xlu1 %v3795_v31, %s3613_s27 }
 0x2d8   : > { %843 = vrot.lane.b32.xlu1 %v3795_v31, %s3614_s28 }
 0x342   : > { %v3805_v33 = vpop.permute.xlu1 %837  ;;  %v3813_v35 = vpop.permute.xlu0 %841 }
 0x343   : > { %920 = vrot.lane.b32.xlu1 %v3805_v33, %s3614_s28 }
 0x346   : > { %v3809_v34 = vpop.permute.xlu1 %839 }
 0x347   : > { %996 = vrot.lane.b32.xlu1 %v3809_v34, %s3614_s28 }
 0x34a   : > { %v844_v36 = vpop.permute.xlu1 %843 }
 0x34b   : > { %1072 = vrot.lane.b32.xlu1 %v3813_v35, %s3614_s28  ;;  %3322 = vmatpush3.xpose.msk.msra.mxu0 %vm845_vm4, %v844_v36 }
 0x34c   : > { %3326 = vmatprep.subr.mxu0 %v3609_v2 }
 0x34e   : > { %3324 = vmatmul.mubr.msk.f32.vlgmr.msra.gmra.mxu0 %vm845_vm4, %v3795_v31 }
 0x34f   : > { %3328 = vmatprep.mubr.msk.f32.mxu0 %vm3610_vm1, %v3609_v2 }
 0x3b5   : > { %v921_v37 = vpop.permute.xlu1 %920 }
 0x3b6   : > { %3327 = vmatpush3.xpose.msk.msra.mxu0 %vm845_vm4, %v921_v37 }
 0x3b7   : > { %3331 = vmatprep.subr.mxu0 %v3609_v2 }
 0x3b9   : > { %3329 = vmatmul.mubr.msk.f32.vlgmr.msra.gmra.mxu0 %vm845_vm4, %v3805_v33  ;;  %v997_v38 = vpop.permute.xlu1 %996 }
 0x3ba   : > { %3332 = vmatpush3.xpose.msk.msra.mxu0 %vm845_vm4, %v997_v38  ;;  %3333 = vmatprep.mubr.msk.f32.mxu0 %vm3610_vm1, %v3609_v2 }
 0x3bb   : > { %3336 = vmatprep.subr.mxu0 %v3609_v2 }
 0x3bd   : > { %3334 = vmatmul.mubr.msk.f32.vlgmr.msra.gmra.mxu0 %vm845_vm4, %v3809_v34  ;;  %v1073_v39 = vpop.permute.xlu1 %1072 }
 0x3be   : > { %3337 = vmatpush3.xpose.msk.msra.mxu0 %vm845_vm4, %v1073_v39  ;;  %3338 = vmatprep.mubr.msk.f32.mxu0 %vm3610_vm1, %v3609_v2 }
 0x3bf   : > { %3346 = vmatprep.subr.mxu0 %v3609_v2 }
 0x3c1   : > { %3339 = vmatmul.mubr.msk.f32.vlgmr.msra.gmra.mxu0 %vm845_vm4, %v3813_v35 }
 0x3c2   : > { %3348 = vmatprep.mubr.msk.f32.mxu0 %vm3610_vm1, %v3609_v2 }
 0x40e   : > { %v916_v43 = vpop.f32.mrf.mxu0 }
 0x40f   : > { %v1148_v45 = vmul.f32 0.35355338, %v916_v43  ;;  %v1523_v43 = vld [vmem:[%s4300_s8] sm:$0xff] }
 0x410   : > { %v3325_v46 = vpop.f32.mrf.mxu0 }
 0x411   : > { %v1154_v47 = vsel %vm3841_vm5, %v1148_v45, -1e+30 }
 0x412   : > { %v1158_v48 = vsel %vm845_vm4, %v1154_v47, -inf }
 0x413   : > { %1159 = vmax.xlane.f32.xlu1 %v1158_v48 }
 0x479   : > { %v992_v49 = vpop.f32.mrf.mxu0 }
 0x47a   : > { %v1149_v50 = vmul.f32 0.35355338, %v992_v49 }
 0x47b   : > { %v3330_v51 = vpop.f32.mrf.mxu0 }
 0x47c   : > { %v1155_v52 = vsel %vm3841_vm5, %v1149_v50, -1e+30 }
 0x47d   : > { %v1068_v53 = vpop.f32.mrf.mxu0  ;;  %v1161_v54 = vsel %vm845_vm4, %v1155_v52, -inf }
 0x47e   : > { %v1150_v55 = vmul.f32 0.35355338, %v1068_v53  ;;  %1162 = vmax.xlane.f32.xlu0 %v1161_v54 }
 0x47f   : > { %v3335_v56 = vpop.f32.mrf.mxu0 }
 0x480   : > { %v1156_v57 = vsel %vm3841_vm5, %v1150_v55, -1e+30 }
 0x481   : > { %v1144_v58 = vpop.f32.mrf.mxu0  ;;  %v1164_v59 = vsel %vm845_vm4, %v1156_v57, -inf }
 0x482   : > { %v1151_v60 = vmul.f32 0.35355338, %v1144_v58  ;;  %1165 = vmax.xlane.f32.xlu1 %v1164_v59  ;;  %v3131_v58 = vld [vmem:[%s4301_s9] ss:$0 sm:$0xff] }
 0x483   : > { %v3340_v61 = vpop.f32.mrf.mxu0 }
 0x484   : > { %v1157_v62 = vsel %vm3841_vm5, %v1151_v60, -1e+30 }
 0x485   : > { %v1167_v63 = vsel %vm845_vm4, %v1157_v62, -inf }
 0x486   : > { %1168 = vmax.xlane.f32.xlu0 %v1167_v63 }
 0x493   : > { %1202 = vrot.lane.b32.xlu1 %v3795_v31, %s3615_s4 }
 0x49c   : > { %v1160_v0 = vpop.xlane.xlu1 %1159 }
 0x49d   : > { %v1170_v1 = vsub.f32 %v1154_v47, %v1160_v0 }
 0x49f   : > { %v1174_v3 = vmul.f32 1.442695, %v1170_v1 }
 0x4a1   : > { %3557 = vpow2.f32 %v1174_v3 }
 0x4ae   : > { %v3558_v4 = vpop.eup %3557 }
 0x4af   : > { %v1182_v5 = vsel %vm845_vm4, %v3558_v4, 0.0 }
 0x4b7   : > { %1183 = vadd.xlane.f32.xlu1 %v1182_v5  ;;  %v1641_v5 = vld [vmem:[%s4304_s12 + $0x18] sm:$0xff] }
 0x507   : > { %v1163_v6 = vpop.xlane.xlu0 %1162 }
 0x508   : > { %v1171_v7 = vsub.f32 %v1155_v52, %v1163_v6  ;;  %v1639_v6 = vld [vmem:[%s4304_s12 + $0x8] sm:$0xff] }
 0x50a   : > { %v1176_v8 = vmul.f32 1.442695, %v1171_v7  ;;  %v1638_v7 = vld [vmem:[%s4304_s12] sm:$0xff] }
 0x50b   : > { %v1166_v10 = vpop.xlane.xlu1 %1165 }
 0x50c   : > { %3559 = vpow2.f32 %v1176_v8  ;;  %v1172_v11 = vsub.f32 %v1156_v57, %v1166_v10 }
 0x50e   : > { %v1178_v12 = vmul.f32 1.442695, %v1172_v11 }
 0x50f   : > { %v1203_v13 = vpop.permute.xlu1 %1202  ;;  %v1169_v14 = vpop.xlane.xlu0 %1168 }
 0x510   : > { %3561 = vpow2.f32 %v1178_v12  ;;  %v1173_v15 = vsub.f32 %v1157_v62, %v1169_v14  ;;  %3342 = vmatpush3.msra.mxu1 %v1203_v13  ;;  %v3132_v13 = vld [vmem:[%s4302_s10] ss:$0 sm:$0xff] }
 0x511   : > { %3351 = vmatprep.subr.mxu1 %v3609_v2 }
 0x512   : > { %v1180_v16 = vmul.f32 1.442695, %v1173_v15  ;;  %v3133_v15 = vld [vmem:[%s4303_s11] ss:$0 sm:$0xff] }
 0x514   : > { %3563 = vpow2.f32 %v1180_v16 }
 0x519   : > { %v3560_v17 = vpop.eup %3559 }
 0x51a   : > { %v1185_v18 = vsel %vm845_vm4, %v3560_v17, 0.0 }
 0x51b   : > { %1186 = vadd.xlane.f32.xlu0 %v1185_v18  ;;  %v1746_v18 = vld [vmem:[%s4306_s14 + $0x78] sm:$0xff] }
 0x51d   : > { %v3562_v19 = vpop.eup %3561 }
 0x51e   : > { %v1188_v20 = vsel %vm845_vm4, %v3562_v19, 0.0 }
 0x51f   : > { %1189 = vadd.xlane.f32.xlu1 %v1188_v20  ;;  %v1744_v20 = vld [vmem:[%s4306_s14 + $0x68] sm:$0xff] }
 0x521   : > { %v3564_v21 = vpop.eup %3563 }
 0x522   : > { %v1191_v22 = vsel %vm845_vm4, %v3564_v21, 0.0 }
 0x523   : > { %1192 = vadd.xlane.f32.xlu0 %v1191_v22  ;;  %v1742_v22 = vld [vmem:[%s4306_s14 + $0x58] sm:$0xff] }
 0x530   : > { %1354 = vrot.lane.b32.xlu1 %v3809_v34, %s3615_s4 }
 0x534   : > { %1430 = vrot.lane.b32.xlu1 %v3813_v35, %s3615_s4 }
 0x539   : > { %1278 = vrot.lane.b32.xlu0 %v3805_v33, %s3615_s4 }
 0x540   : > { %v1184_v23 = vpop.xlane.xlu1 %1183 }
 0x541   : > { %3565 = vrcp.f32 %v1184_v23  ;;  %v1741_v23 = vld [vmem:[%s4306_s14 + $0x50] sm:$0xff] }
 0x54e   : > { %v3566_v24 = vpop.eup %3565 }
 0x54f   : > { %v1198_v25 = vmul.f32 %v3566_v24, %v3558_v4  ;;  %v1740_v24 = vld [vmem:[%s4306_s14 + $0x48] sm:$0xff] }
 0x551   : > { %3344 = vmatmul.mubr.msk.f32.vlgmr.msra.gmra.mxu1 %vm845_vm4, %v1198_v25  ;;  %v1739_v25 = vld [vmem:[%s4306_s14 + $0x40] sm:$0xff] }
 0x552   : > { %3353 = vmatprep.mubr.msk.f32.mxu1 %vm3610_vm1, %v3609_v2 }
 0x5a4   : > { %v1187_v26 = vpop.xlane.xlu0 %1186 }
 0x5a5   : > { %3567 = vrcp.f32 %v1187_v26  ;;  %v1738_v26 = vld [vmem:[%s4306_s14 + $0x38] sm:$0xff] }
 0x5a8   : > { %v1190_v27 = vpop.xlane.xlu1 %1189 }
 0x5a9   : > { %3569 = vrcp.f32 %v1190_v27  ;;  %v1737_v27 = vld [vmem:[%s4306_s14 + $0x30] sm:$0xff] }
 0x5ac   : > { %v1355_v28 = vpop.permute.xlu1 %1354  ;;  %v1193_v29 = vpop.xlane.xlu0 %1192 }
 0x5ad   : > { %3571 = vrcp.f32 %v1193_v29  ;;  %3352 = vmatpush3.msra.mxu1 %v1355_v28  ;;  %v1736_v28 = vld [vmem:[%s4306_s14 + $0x28] sm:$0xff]  ;;  %v1735_v29 = vld [vmem:[%s4306_s14 + $0x20] sm:$0xff] }
 0x5ae   : > { %3361 = vmatprep.subr.mxu1 %v3609_v2 }
 0x5b0   : > { %v1279_v30 = vpop.permute.xlu0 %1278  ;;  %v1431_v33 = vpop.permute.xlu1 %1430 }
 0x5b1   : > { %3347 = vmatpush3.msra.mxu0 %v1279_v30  ;;  %v1734_v30 = vld [vmem:[%s4306_s14 + $0x18] sm:$0xff] }
 0x5b2   : > { %v3568_v31 = vpop.eup %3567  ;;  %3356 = vmatprep.subr.mxu0 %v3609_v2 }
 0x5b3   : > { %v1199_v32 = vmul.f32 %v3568_v31, %v3560_v17  ;;  %v1733_v31 = vld [vmem:[%s4306_s14 + $0x10] sm:$0xff] }
 0x5b5   : > { %3349 = vmatmul.mubr.msk.f32.vlgmr.msra.gmra.mxu0 %vm845_vm4, %v1199_v32  ;;  %v1732_v32 = vld [vmem:[%s4306_s14 + $0x8] sm:$0xff] }
 0x5b6   : > { %v3570_v34 = vpop.eup %3569  ;;  %3357 = vmatpush3.msra.mxu0 %v1431_v33  ;;  %3358 = vmatprep.mubr.msk.f32.mxu0 %vm3610_vm1, %v3609_v2  ;;  %v1731_v33 = vld [vmem:[%s4306_s14] sm:$0xff] }
 0x5b7   : > { %v1200_v35 = vmul.f32 %v3570_v34, %v3562_v19  ;;  %3372 = vmatprep.subr.mxu0 %v3609_v2  ;;  %v1745_v19 = vld [vmem:[%s4306_s14 + $0x70] sm:$0xff]  ;;  %v3134_v34 = vld [vmem:[%s4305_s13] ss:$0 sm:$0xff] }
 0x5b9   : > { %3354 = vmatmul.mubr.msk.f32.vlgmr.msra.gmra.mxu1 %vm845_vm4, %v1200_v35 }
 0x5ba   : > { %v3572_v36 = vpop.eup %3571  ;;  %3369 = vmatprep.mubr.msk.f32.mxu1 %vm3610_vm1, %v3609_v2  ;;  %3362 = vmatpush3.msra.mxu1 %v1526_v40 }
 0x5bb   : > { %v1201_v37 = vmul.f32 %v3572_v36, %v3564_v21  ;;  %3363 = vmatprep.subr.mxu1 %v3609_v2  ;;  %v1743_v21 = vld [vmem:[%s4306_s14 + $0x60] sm:$0xff] }
 0x5bc   : > { %3364 = vmatpush3.msra.mxu1 %v1525_v41 }
 0x5bd   : > { %3359 = vmatmul.mubr.msk.f32.vlgmr.msra.gmra.mxu0 %vm845_vm4, %v1201_v37  ;;  %3365 = vmatprep.subr.mxu1 %v3609_v2 }
 0x5be   : > { %3380 = vmatprep.mubr.msk.f32.mxu0 %vm3610_vm1, %v3609_v2  ;;  %3366 = vmatpush3.msra.mxu1 %v1524_v42 }
 0x5bf   : > { %3367 = vmatprep.subr.mxu1 %v3609_v2  ;;  %3373 = vmatpush3.msra.mxu0 %v1641_v5 }
 0x5c0   : > { %3368 = vmatpush3.msra.mxu1 %v1523_v43  ;;  %3374 = vmatprep.subr.mxu0 %v3609_v2 }
 0x5c1   : > { %3383 = vmatprep.subr.mxu1 %v3609_v2 }
 0x611   : > { %v1274_v38 = vpop.f32.mrf.mxu1 }
 0x613   : > { %v3345_v39 = vpop.f32.mrf.mxu1 }
 0x675   : > { %v1350_v45 = vpop.f32.mrf.mxu0 }
 0x676   : > { %1507 = vrot.lane.b32.xlu0 %v1350_v45, %s4317_s30 }
 0x677   : > { %v3350_v46 = vpop.f32.mrf.mxu0 }
 0x679   : > { %v1426_v47 = vpop.f32.mrf.mxu1 }
 0x67a   : > { %1511 = vrot.lane.b32.xlu1 %v1426_v47, %s4316_s0 }
 0x67b   : > { %v3355_v48 = vpop.f32.mrf.mxu1 }
 0x67d   : > { %v1502_v49 = vpop.f32.mrf.mxu0 }
 0x67e   : > { %1515 = vrot.lane.b32.xlu0 %v1502_v49, %s4315_s1  ;;  %v3136_v49 = vld [vmem:[%s4307_s15] ss:$0 sm:$0xff]  ;;  %s4330_s1 = smov 8  }
 0x67f   : > { %v3360_v50 = vpop.f32.mrf.mxu0 }
 0x6e8   : > { %v1508_v51 = vpop.permute.xlu0 %1507 }
 0x6e9   : > { %v1518_v53 = vsel %vm845_vm4, %v1274_v38, %v1508_v51 }
 0x6ec   : > { %v1512_v52 = vpop.permute.xlu1 %1511 }
 0x6ed   : > { %v1520_v54 = vsel %vm1519_vm6, %v1518_v53, %v1512_v52 }
 0x6f0   : > { %v1516_v55 = vpop.permute.xlu0 %1515 }
 0x6f1   : > { %v1522_v56 = vsel %vm1521_vm7, %v1520_v54, %v1516_v55 }
 0x6f2   : > { %3370 = vmatmul.mubr.msk.f32.vlgmr.msra.gmra.mxu1 %vm723_vm3, %v1522_v56 }
 0x6f3   : > { %3415 = vmatprep.mubr.msk.f32.mxu1 %vm3610_vm1, %v3609_v2  ;;  %3384 = vmatpush3.msra.mxu1 %v1746_v18 }
 0x6f4   : > { %3385 = vmatprep.subr.mxu1 %v3609_v2 }
 0x6f5   : > { %3386 = vmatpush3.msra.mxu1 %v1745_v19 }
 0x6f6   : > { %3387 = vmatprep.subr.mxu1 %v3609_v2 }
 0x6f7   : > { %3388 = vmatpush3.msra.mxu1 %v1744_v20 }
 0x6f8   : > { %3389 = vmatprep.subr.mxu1 %v3609_v2 }
 0x6f9   : > { %3390 = vmatpush3.msra.mxu1 %v1743_v21 }
 0x6fa   : > { %3391 = vmatprep.subr.mxu1 %v3609_v2 }
 0x6fb   : > { %3392 = vmatpush3.msra.mxu1 %v1742_v22 }
 0x6fc   : > { %3393 = vmatprep.subr.mxu1 %v3609_v2 }
 0x6fd   : > { %3394 = vmatpush3.msra.mxu1 %v1741_v23 }
 0x6fe   : > { %3395 = vmatprep.subr.mxu1 %v3609_v2 }
 0x6ff   : > { %3396 = vmatpush3.msra.mxu1 %v1740_v24 }
 0x700   : > { %3397 = vmatprep.subr.mxu1 %v3609_v2 }
 0x701   : > { %3398 = vmatpush3.msra.mxu1 %v1739_v25 }
 0x702   : > { %3399 = vmatprep.subr.mxu1 %v3609_v2 }
 0x703   : > { %3400 = vmatpush3.msra.mxu1 %v1738_v26 }
 0x704   : > { %3401 = vmatprep.subr.mxu1 %v3609_v2 }
 0x705   : > { %3402 = vmatpush3.msra.mxu1 %v1737_v27 }
 0x706   : > { %3403 = vmatprep.subr.mxu1 %v3609_v2 }
 0x707   : > { %3404 = vmatpush3.msra.mxu1 %v1736_v28 }
 0x708   : > { %3405 = vmatprep.subr.mxu1 %v3609_v2 }
 0x709   : > { %3406 = vmatpush3.msra.mxu1 %v1735_v29 }
 0x70a   : > { %3407 = vmatprep.subr.mxu1 %v3609_v2 }
 0x70b   : > { %3408 = vmatpush3.msra.mxu1 %v1734_v30 }
 0x70c   : > { %3409 = vmatprep.subr.mxu1 %v3609_v2 }
 0x70d   : > { %3410 = vmatpush3.msra.mxu1 %v1733_v31 }
 0x70e   : > { %3411 = vmatprep.subr.mxu1 %v3609_v2 }
 0x70f   : > { %3412 = vmatpush3.msra.mxu1 %v1732_v32 }
 0x710   : > { %3413 = vmatprep.subr.mxu1 %v3609_v2 }
 0x711   : > { %3414 = vmatpush3.msra.mxu1 %v1731_v33 }
 0x712   : > { %3459 = vmatprep.subr.mxu1 %v3609_v2 }
 0x7b2   : > { %v1596_v57 = vpop.f32.mrf.mxu1 }
 0x7b3   : > { %v1600_v59 = vadd.f32 %v1596_v57, %v3761_v9  ;;  %v1640_v9 = vld [vmem:[%s4304_s12 + $0x10] sm:$0xff] }
 0x7b4   : > { %v3371_v60 = vpop.f32.mrf.mxu1  ;;  %3375 = vmatpush3.msra.mxu0 %v1640_v9  ;;  %v3140_v9 = vld [vmem:[%s4297_s5 + $0x1] ss:$0 sm:$0xff] }
 0x7b5   : > { %v3914_v61 = vadd.f32 %v3131_v58, %v1600_v59  ;;  %3376 = vmatprep.subr.mxu0 %v3609_v2  ;;  %v3144_v59 = vld [vmem:[%s4298_s6 + $0x38] sm:$0xff]  ;;  %v3143_v60 = vld [vmem:[%s4298_s6 + $0x30] sm:$0xff] }
 0x7b6   : > { %3377 = vmatpush3.msra.mxu0 %v1639_v6 }
 0x7b7   : > { %v1611_v62 = vsel %vm723_vm3, %v3914_v61, 0.0  ;;  %3378 = vmatprep.subr.mxu0 %v3609_v2 }
 0x7b8   : > { %1612 = vadd.xlane.f32.xlu1 %v1611_v62  ;;  %3379 = vmatpush3.msra.mxu0 %v1638_v7  ;;  %v3141_v62 = vld [vmem:[%s4298_s6 + $0x20] sm:$0xff] }
 0x7b9   : > { %3418 = vmatprep.subr.mxu0 %v3609_v2 }
 0x841   : > { %v1613_v63 = vpop.xlane.xlu1 %1612 }
 0x842   : > { %v1614_v0 = vmul.f32 0.03125, %v1613_v63 }
 0x844   : > { %v1615_v1 = vsub.f32 %v3914_v61, %v1614_v0 }
 0x846   : > { %v1616_v3 = vmul.f32 %v1615_v1, %v1615_v1 }
 0x848   : > { %v1617_v4 = vsel %vm723_vm3, %v1616_v3, 0.0 }
 0x849   : > { %1618 = vadd.xlane.f32.xlu0 %v1617_v4  ;;  %v3139_v4 = vld [vmem:[%s4327_s21 + $0x1] ss:$0 sm:$0xff] }
 0x8d2   : > { %v1619_v8 = vpop.xlane.xlu0 %1618 }
 0x8d3   : > { %v1620_v10 = vmul.f32 0.03125, %v1619_v8  ;;  %v3146_v8 = vld [vmem:[%s4299_s7 + $0x1] ss:$0 sm:$0xff] }
 0x8d5   : > { %v1621_v11 = vadd.f32 1e-05, %v1620_v10 }
 0x8d7   : > { %3573 = vrsqrt.f32 %v1621_v11 }
 0x8e4   : > { %v3574_v12 = vpop.eup %3573 }
 0x8e5   : > { %v1623_v14 = vmul.f32 %v3574_v12, %v1615_v1 }
 0x8e7   : > { %v1630_v16 = vmul.f32 %v3132_v13, %v1623_v14 }
 0x8e9   : > { %v1637_v17 = vadd.f32 %v3133_v15, %v1630_v16 }
 0x8eb   : > { %3381 = vmatmul.mubr.msk.f32.vlgmr.msra.gmra.mxu0 %vm723_vm3, %v1637_v17 }
 0x8ec   : > { %3426 = vmatprep.mubr.msk.f32.mxu0 %vm3610_vm1, %v3609_v2  ;;  %3419 = vmatpush3.msra.mxu0 %v3144_v59 }
 0x8ed   : > { %3420 = vmatprep.subr.mxu0 %v3609_v2 }
 0x8ee   : > { %3421 = vmatpush3.msra.mxu0 %v3143_v60 }
 0x8ef   : > { %3422 = vmatprep.subr.mxu0 %v3609_v2 }
 0x9ab   : > { %v1718_v35 = vpop.f32.mrf.mxu0 }
 0x9ac   : > { %v1719_v36 = vadd.f32 %v3134_v34, %v1718_v35 }
 0x9ad   : > { %v3382_v37 = vpop.f32.mrf.mxu0 }
 0x9ae   : > { %v1723_v38 = vmul.f32 0.044715, %v1719_v36  ;;  %v1722_v45 = vmul.f32 0.5, %v1719_v36 }
 0x9b0   : > { %v1724_v39 = vmul.f32 %v1723_v38, %v1719_v36 }
 0x9b2   : > { %v1725_v40 = vmul.f32 %v1724_v39, %v1719_v36 }
 0x9b4   : > { %v1726_v41 = vadd.f32 %v1725_v40, %v1719_v36 }
 0x9b6   : > { %v1727_v42 = vmul.f32 0.7978846, %v1726_v41 }
 0x9b8   : > { %3575 = vtanh.f32 %v1727_v42 }
 0x9c5   : > { %v3576_v43 = vpop.eup %3575 }
 0x9c6   : > { %v1729_v46 = vadd.f32 1.0, %v3576_v43 }
 0x9c8   : > { %v1730_v47 = vmul.f32 %v1729_v46, %v1722_v45 }
 0x9ca   : > { %3416 = vmatmul.mubr.f32.vlgmr.msra.gmra.mxu1 %v1730_v47 }
 0x9cb   : > { %3461 = vmatprep.mubr.msk.f32.mxu1 %vm3610_vm1, %v3609_v2 }
 0xa8a   : > { %v1813_v48 = vpop.f32.mrf.mxu1 }
 0xa8b   : > { %v1817_v50 = vadd.f32 %v1813_v48, %v3914_v61  ;;  %v3142_v61 = vld [vmem:[%s4298_s6 + $0x28] sm:$0xff] }
 0xa8c   : > { %v3417_v51 = vpop.f32.mrf.mxu1  ;;  %3423 = vmatpush3.msra.mxu0 %v3142_v61 }
 0xa8d   : > { %v4018_v52 = vadd.f32 %v3136_v49, %v1817_v50  ;;  %3424 = vmatprep.subr.mxu0 %v3609_v2 }
 0xa8e   : > { %3425 = vmatpush3.msra.mxu0 %v3141_v62 }
 0xa8f   : > { %v1830_v53 = vsel %vm723_vm3, %v4018_v52, 0.0  ;;  %3429 = vmatprep.subr.mxu0 %v3609_v2 }
 0xa90   : > { %1831 = vadd.xlane.f32.xlu0 %v1830_v53 }
 0xb19   : > { %v1832_v54 = vpop.xlane.xlu0 %1831 }
 0xb1a   : > { %v1833_v55 = vmul.f32 0.03125, %v1832_v54 }
 0xb1c   : > { %v1834_v56 = vsub.f32 %v4018_v52, %v1833_v55 }
 0xb1e   : > { %v1835_v57 = vmul.f32 %v1834_v56, %v1834_v56 }
 0xb20   : > { %v1836_v58 = vsel %vm723_vm3, %v1835_v57, 0.0 }
 0xb21   : > { %1837 = vadd.xlane.f32.xlu1 %v1836_v58 }
 0xbaa   : > { %v1838_v63 = vpop.xlane.xlu1 %1837 }
 0xbab   : > { %v1839_v0 = vmul.f32 0.03125, %v1838_v63 }
 0xbad   : > { %v1840_v1 = vadd.f32 1e-05, %v1839_v0 }
 0xbaf   : > { %3577 = vrsqrt.f32 %v1840_v1 }
 0xbbc   : > { %v3578_v3 = vpop.eup %3577 }
 0xbbd   : > { %v1842_v5 = vmul.f32 %v3578_v3, %v1834_v56 }
 0xbbf   : > { %v1849_v6 = vmul.f32 %v3139_v4, %v1842_v5 }
 0xbc1   : > { %v1856_v7 = vadd.f32 %v3140_v9, %v1849_v6 }
 0xbc3   : > { %3427 = vmatmul.mubr.msk.f32.vlgmr.msra.gmra.mxu0 %vm723_vm3, %v1856_v7 }
 0xbc4   : > { %3431 = vmatprep.mubr.msk.f32.mxu0 %vm3610_vm1, %v3609_v2 }
 0xc83   : > { %v1939_v10 = vpop.f32.mrf.mxu0 }
 0xc84   : > { %v1940_v11 = vadd.f32 %v3146_v8, %v1939_v10 }
 0xc85   : > { %v3428_v12 = vpop.f32.mrf.mxu0 }
 0xc86   : > { %1946 = vrot.lane.b32.xlu1 %v1940_v11, %s3613_s27  ;;  %1944 = vrot.lane.b32.xlu0 %v1940_v11, %s3612_s26 }
 0xc8a   : > { %1948 = vrot.lane.b32.xlu1 %v1940_v11, %s3611_s3  ;;  %1950 = vrot.lane.b32.xlu0 %v1940_v11, %s3614_s28 }
 0xcf8   : > { %v4056_v13 = vpop.permute.xlu1 %1946  ;;  %v4058_v14 = vpop.permute.xlu0 %1944 }
 0xcf9   : > { %2102 = vrot.lane.b32.xlu0 %v4056_v13, %s3614_s28  ;;  %2026 = vrot.lane.b32.xlu1 %v4058_v14, %s3614_s28 }
 0xcfc   : > { %v4064_v15 = vpop.permute.xlu1 %1948  ;;  %v1951_v16 = vpop.permute.xlu0 %1950 }
 0xcfd   : > { %2178 = vrot.lane.b32.xlu1 %v4064_v15, %s3614_s28  ;;  %3430 = vmatpush3.xpose.msk.msra.mxu0 %vm845_vm4, %v1951_v16  ;;  %v3163_v16 = vld [vmem:[%s4300_s8 + $0x38] sm:$0xff] }
 0xcfe   : > { %3434 = vmatprep.subr.mxu0 %v3609_v2 }
 0xd00   : > { %3432 = vmatmul.mubr.msk.f32.vlgmr.msra.gmra.mxu0 %vm845_vm4, %v1940_v11 }
 0xd01   : > { %3436 = vmatprep.mubr.msk.f32.mxu0 %vm3610_vm1, %v3609_v2 }
 0xd6b   : > { %v2027_v17 = vpop.permute.xlu1 %2026  ;;  %v2103_v18 = vpop.permute.xlu0 %2102 }
 0xd6c   : > { %3435 = vmatpush3.xpose.msk.msra.mxu0 %vm845_vm4, %v2027_v17  ;;  %v3162_v17 = vld [vmem:[%s4300_s8 + $0x30] sm:$0xff] }
 0xd6d   : > { %3439 = vmatprep.subr.mxu0 %v3609_v2 }
 0xd6f   : > { %3437 = vmatmul.mubr.msk.f32.vlgmr.msra.gmra.mxu0 %vm845_vm4, %v4058_v14  ;;  %v2179_v19 = vpop.permute.xlu1 %2178 }
 0xd70   : > { %3440 = vmatpush3.xpose.msk.msra.mxu0 %vm845_vm4, %v2103_v18  ;;  %3441 = vmatprep.mubr.msk.f32.mxu0 %vm3610_vm1, %v3609_v2  ;;  %v3161_v18 = vld [vmem:[%s4300_s8 + $0x28] sm:$0xff] }
 0xd71   : > { %3444 = vmatprep.subr.mxu0 %v3609_v2 }
 0xd73   : > { %3442 = vmatmul.mubr.msk.f32.vlgmr.msra.gmra.mxu0 %vm845_vm4, %v4056_v13 }
 0xd74   : > { %3445 = vmatpush3.xpose.msk.msra.mxu0 %vm845_vm4, %v2179_v19  ;;  %3446 = vmatprep.mubr.msk.f32.mxu0 %vm3610_vm1, %v3609_v2  ;;  %v3160_v19 = vld [vmem:[%s4300_s8 + $0x20] sm:$0xff] }
 0xd75   : > { %3449 = vmatprep.subr.mxu0 %v3609_v2 }
 0xd77   : > { %3447 = vmatmul.mubr.msk.f32.vlgmr.msra.gmra.mxu0 %vm845_vm4, %v4064_v15 }
 0xd78   : > { %3451 = vmatprep.mubr.msk.f32.mxu0 %vm3610_vm1, %v3609_v2 }
 0xdc0   : > { %v2022_v20 = vpop.f32.mrf.mxu0 }
 0xdc1   : > { %v2254_v21 = vmul.f32 0.35355338, %v2022_v20 }
 0xdc2   : > { %v3433_v22 = vpop.f32.mrf.mxu0 }
 0xdc3   : > { %v2258_v23 = vsel %vm3841_vm5, %v2254_v21, -1e+30 }
 0xdc4   : > { %v2262_v24 = vsel %vm845_vm4, %v2258_v23, -inf }
 0xdc5   : > { %2263 = vmax.xlane.f32.xlu0 %v2262_v24 }
 0xe2f   : > { %v2098_v25 = vpop.f32.mrf.mxu0 }
 0xe30   : > { %v2255_v26 = vmul.f32 0.35355338, %v2098_v25 }
 0xe31   : > { %v3438_v27 = vpop.f32.mrf.mxu0 }
 0xe32   : > { %v2259_v28 = vsel %vm3841_vm5, %v2255_v26, -1e+30 }
 0xe33   : > { %v2174_v29 = vpop.f32.mrf.mxu0  ;;  %v2265_v30 = vsel %vm845_vm4, %v2259_v28, -inf }
 0xe34   : > { %v2256_v31 = vmul.f32 0.35355338, %v2174_v29  ;;  %2266 = vmax.xlane.f32.xlu1 %v2265_v30 }
 0xe35   : > { %v3443_v32 = vpop.f32.mrf.mxu0 }
 0xe36   : > { %v2260_v33 = vsel %vm3841_vm5, %v2256_v31, -1e+30 }
 0xe37   : > { %v2250_v34 = vpop.f32.mrf.mxu0  ;;  %v2268_v35 = vsel %vm845_vm4, %v2260_v33, -inf }
 0xe38   : > { %v2257_v36 = vmul.f32 0.35355338, %v2250_v34  ;;  %2269 = vmax.xlane.f32.xlu0 %v2268_v35 }
 0xe39   : > { %v3448_v37 = vpop.f32.mrf.mxu0 }
 0xe3a   : > { %v2261_v38 = vsel %vm3841_vm5, %v2257_v36, -1e+30 }
 0xe3b   : > { %v2271_v39 = vsel %vm845_vm4, %v2261_v38, -inf }
 0xe3c   : > { %2272 = vmax.xlane.f32.xlu0 %v2271_v39 }
 0xe45   : > { %2306 = vrot.lane.b32.xlu1 %v1940_v11, %s3615_s4 }
 0xe4e   : > { %v2264_v40 = vpop.xlane.xlu0 %2263 }
 0xe4f   : > { %v2274_v41 = vsub.f32 %v2258_v23, %v2264_v40 }
 0xe51   : > { %v2278_v42 = vmul.f32 1.442695, %v2274_v41 }
 0xe53   : > { %3579 = vpow2.f32 %v2278_v42 }
 0xe60   : > { %v3580_v43 = vpop.eup %3579 }
 0xe61   : > { %v2286_v45 = vsel %vm845_vm4, %v3580_v43, 0.0 }
 0xe69   : > { %2287 = vadd.xlane.f32.xlu1 %v2286_v45  ;;  %v3172_v45 = vld [vmem:[%s4304_s12 + $0x28] sm:$0xff] }
 0xebd   : > { %v2267_v46 = vpop.xlane.xlu1 %2266 }
 0xebe   : > { %v2275_v47 = vsub.f32 %v2259_v28, %v2267_v46  ;;  %v3171_v46 = vld [vmem:[%s4304_s12 + $0x20] sm:$0xff] }
 0xec0   : > { %v2280_v48 = vmul.f32 1.442695, %v2275_v47 }
 0xec1   : > { %v2307_v49 = vpop.permute.xlu1 %2306  ;;  %v2270_v50 = vpop.xlane.xlu0 %2269 }
 0xec2   : > { %3581 = vpow2.f32 %v2280_v48  ;;  %v2276_v44 = vsub.f32 %v2260_v33, %v2270_v50  ;;  %3450 = vmatpush3.msra.mxu0 %v2307_v49  ;;  %v3166_v33 = vld [vmem:[%s4301_s9 + $0x1] ss:$0 sm:$0xff] }
 0xec3   : > { %3454 = vmatprep.subr.mxu0 %v3609_v2 }
 0xec4   : > { %v2282_v51 = vmul.f32 1.442695, %v2276_v44  ;;  %v3169_v44 = vld [vmem:[%s4302_s10 + $0x1] ss:$0 sm:$0xff] }
 0xec5   : > { %v2273_v53 = vpop.xlane.xlu0 %2272 }
 0xec6   : > { %3583 = vpow2.f32 %v2282_v51  ;;  %v2277_v54 = vsub.f32 %v2261_v38, %v2273_v53  ;;  %v3170_v53 = vld [vmem:[%s4303_s11 + $0x1] ss:$0 sm:$0xff] }
 0xec8   : > { %v2284_v55 = vmul.f32 1.442695, %v2277_v54 }
 0xeca   : > { %3585 = vpow2.f32 %v2284_v55 }
 0xecf   : > { %v3582_v56 = vpop.eup %3581 }
 0xed0   : > { %v2289_v57 = vsel %vm845_vm4, %v3582_v56, 0.0 }
 0xed1   : > { %2290 = vadd.xlane.f32.xlu0 %v2289_v57  ;;  %v3192_v57 = vld [vmem:[%s4306_s14 + $0xf0] sm:$0xff] }
 0xed3   : > { %v3584_v58 = vpop.eup %3583 }
 0xed4   : > { %v2292_v59 = vsel %vm845_vm4, %v3584_v58, 0.0 }
 0xed5   : > { %2293 = vadd.xlane.f32.xlu1 %v2292_v59  ;;  %v3190_v59 = vld [vmem:[%s4306_s14 + $0xe0] sm:$0xff] }
 0xed7   : > { %v3586_v60 = vpop.eup %3585 }
 0xed8   : > { %v2295_v61 = vsel %vm845_vm4, %v3586_v60, 0.0 }
 0xed9   : > { %2296 = vadd.xlane.f32.xlu0 %v2295_v61  ;;  %v3188_v61 = vld [vmem:[%s4306_s14 + $0xd0] sm:$0xff] }
 0xee6   : > { %2458 = vrot.lane.b32.xlu1 %v4056_v13, %s3615_s4 }
 0xeea   : > { %2534 = vrot.lane.b32.xlu1 %v4064_v15, %s3615_s4 }
 0xeef   : > { %2382 = vrot.lane.b32.xlu0 %v4058_v14, %s3615_s4 }
 0xef2   : > { %v2288_v62 = vpop.xlane.xlu1 %2287 }
 0xef3   : > { %3587 = vrcp.f32 %v2288_v62  ;;  %v3187_v62 = vld [vmem:[%s4306_s14 + $0xc8] sm:$0xff] }
 0xf00   : > { %v3588_v63 = vpop.eup %3587 }
 0xf01   : > { %v2302_v0 = vmul.f32 %v3588_v63, %v3580_v43  ;;  %v3174_v43 = vld [vmem:[%s4304_s12 + $0x38] sm:$0xff]  ;;  %v3186_v63 = vld [vmem:[%s4306_s14 + $0xc0] sm:$0xff] }
 0xf03   : > { %3452 = vmatmul.mubr.msk.f32.vlgmr.msra.gmra.mxu0 %vm845_vm4, %v2302_v0  ;;  %v3185_v0 = vld [vmem:[%s4306_s14 + $0xb8] sm:$0xff] }
 0xf04   : > { %3456 = vmatprep.mubr.msk.f32.mxu0 %vm3610_vm1, %v3609_v2 }
 0xf5a   : > { %v2291_v1 = vpop.xlane.xlu0 %2290 }
 0xf5b   : > { %3589 = vrcp.f32 %v2291_v1  ;;  %v3184_v1 = vld [vmem:[%s4306_s14 + $0xb0] sm:$0xff] }
 0xf5e   : > { %v2294_v3 = vpop.xlane.xlu1 %2293 }
 0xf5f   : > { %3591 = vrcp.f32 %v2294_v3  ;;  %v3183_v3 = vld [vmem:[%s4306_s14 + $0xa8] sm:$0xff] }
 0xf62   : > { %v2459_v4 = vpop.permute.xlu1 %2458  ;;  %v2297_v5 = vpop.xlane.xlu0 %2296 }
 0xf63   : > { %3593 = vrcp.f32 %v2297_v5  ;;  %3460 = vmatpush3.msra.mxu1 %v2459_v4  ;;  %v3182_v4 = vld [vmem:[%s4306_s14 + $0xa0] sm:$0xff]  ;;  %v3181_v5 = vld [vmem:[%s4306_s14 + $0x98] sm:$0xff] }
 0xf64   : > { %3469 = vmatprep.subr.mxu1 %v3609_v2 }
 0xf66   : > { %v2383_v9 = vpop.permute.xlu0 %2382  ;;  %v2535_v8 = vpop.permute.xlu1 %2534 }
 0xf67   : > { %3455 = vmatpush3.msra.mxu0 %v2383_v9  ;;  %v3180_v9 = vld [vmem:[%s4306_s14 + $0x90] sm:$0xff] }
 0xf68   : > { %v3590_v6 = vpop.eup %3589  ;;  %3464 = vmatprep.subr.mxu0 %v3609_v2 }
 0xf69   : > { %v2303_v7 = vmul.f32 %v3590_v6, %v3582_v56  ;;  %v3193_v56 = vld [vmem:[%s4306_s14 + $0xf8] sm:$0xff]  ;;  %v3179_v6 = vld [vmem:[%s4306_s14 + $0x88] sm:$0xff] }
 0xf6b   : > { %3457 = vmatmul.mubr.msk.f32.vlgmr.msra.gmra.mxu0 %vm845_vm4, %v2303_v7  ;;  %v3178_v7 = vld [vmem:[%s4306_s14 + $0x80] sm:$0xff] }
 0xf6c   : > { %v3592_v10 = vpop.eup %3591  ;;  %3465 = vmatpush3.msra.mxu0 %v2535_v8  ;;  %3466 = vmatprep.mubr.msk.f32.mxu0 %vm3610_vm1, %v3609_v2  ;;  %v3176_v8 = vld [vmem:[%s4305_s13 + $0x1] ss:$0 sm:$0xff] }
 0xf6d   : > { %v2304_v11 = vmul.f32 %v3592_v10, %v3584_v58  ;;  %3480 = vmatprep.subr.mxu0 %v3609_v2  ;;  %v3191_v58 = vld [vmem:[%s4306_s14 + $0xe8] sm:$0xff] }
 0xf6f   : > { %3462 = vmatmul.mubr.msk.f32.vlgmr.msra.gmra.mxu1 %vm845_vm4, %v2304_v11 }
 0xf70   : > { %v3594_v12 = vpop.eup %3593  ;;  %3477 = vmatprep.mubr.msk.f32.mxu1 %vm3610_vm1, %v3609_v2  ;;  %3470 = vmatpush3.msra.mxu1 %v3163_v16 }
 0xf71   : > { %v2305_v13 = vmul.f32 %v3594_v12, %v3586_v60  ;;  %3471 = vmatprep.subr.mxu1 %v3609_v2  ;;  %v3189_v60 = vld [vmem:[%s4306_s14 + $0xd8] sm:$0xff] }
 0xf72   : > { %3472 = vmatpush3.msra.mxu1 %v3162_v17 }
 0xf73   : > { %3467 = vmatmul.mubr.msk.f32.vlgmr.msra.gmra.mxu0 %vm845_vm4, %v2305_v13  ;;  %3473 = vmatprep.subr.mxu1 %v3609_v2 }
 0xf74   : > { %3488 = vmatprep.mubr.msk.f32.mxu0 %vm3610_vm1, %v3609_v2  ;;  %3474 = vmatpush3.msra.mxu1 %v3161_v18 }
 0xf75   : > { %3475 = vmatprep.subr.mxu1 %v3609_v2  ;;  %3481 = vmatpush3.msra.mxu0 %v3174_v43  ;;  %v3197_v43 = vld [vmem:[%s4309_s17] ss:$0 sm:$0xff] }
 0xf76   : > { %3476 = vmatpush3.msra.mxu1 %v3160_v19  ;;  %3482 = vmatprep.subr.mxu0 %v3609_v2 }
 0xf77   : > { %3491 = vmatprep.subr.mxu1 %v3609_v2 }
 0xfc3   : > { %v2378_v14 = vpop.f32.mrf.mxu0 }
 0xfc5   : > { %v3453_v15 = vpop.f32.mrf.mxu0 }
0x102b   : > { %v2454_v20 = vpop.f32.mrf.mxu0 }
0x102c   : > { %2611 = vrot.lane.b32.xlu0 %v2454_v20, %s4330_s1  ;;  %s4333_s1 = sshll.u32 %s4335_s24, 3 }
0x102d   : > { %v3458_v21 = vpop.f32.mrf.mxu0  ;;  %s626_s30 = scalar_lea.vmem %s4312_s20, %s4333_s1 }
0x102f   : > { %v2530_v22 = vpop.f32.mrf.mxu1 }
0x1030   : > { %2615 = vrot.lane.b32.xlu1 %v2530_v22, %s4331_s25 }
0x1031   : > { %v3463_v23 = vpop.f32.mrf.mxu1 }
0x1032   : > { %v3195_v23 = vld [vmem:[%s4307_s15 + $0x1] ss:$0 sm:$0xff] }
0x1033   : > { %v2606_v24 = vpop.f32.mrf.mxu0 }
0x1034   : > { %2619 = vrot.lane.b32.xlu0 %v2606_v24, %s4332_s29 }
0x1035   : > { %v3468_v25 = vpop.f32.mrf.mxu0 }
0x109e   : > { %v2612_v26 = vpop.permute.xlu0 %2611 }
0x109f   : > { %v2622_v28 = vsel %vm845_vm4, %v2378_v14, %v2612_v26 }
0x10a2   : > { %v2616_v27 = vpop.permute.xlu1 %2615 }
0x10a3   : > { %v2623_v29 = vsel %vm1519_vm6, %v2622_v28, %v2616_v27 }
0x10a6   : > { %v2620_v30 = vpop.permute.xlu0 %2619 }
0x10a7   : > { %v2624_v31 = vsel %vm1521_vm7, %v2623_v29, %v2620_v30 }
0x10a8   : > { %3478 = vmatmul.mubr.msk.f32.vlgmr.msra.gmra.mxu1 %vm723_vm3, %v2624_v31 }
0x10a9   : > { %3523 = vmatprep.mubr.msk.f32.mxu1 %vm3610_vm1, %v3609_v2  ;;  %3492 = vmatpush3.msra.mxu1 %v3193_v56 }
0x10aa   : > { %3493 = vmatprep.subr.mxu1 %v3609_v2 }
0x10ab   : > { %3494 = vmatpush3.msra.mxu1 %v3192_v57 }
0x10ac   : > { %3495 = vmatprep.subr.mxu1 %v3609_v2 }
0x10ad   : > { %3496 = vmatpush3.msra.mxu1 %v3191_v58 }
0x10ae   : > { %3497 = vmatprep.subr.mxu1 %v3609_v2 }
0x10af   : > { %3498 = vmatpush3.msra.mxu1 %v3190_v59 }
0x10b0   : > { %3499 = vmatprep.subr.mxu1 %v3609_v2 }
0x10b1   : > { %3500 = vmatpush3.msra.mxu1 %v3189_v60 }
0x10b2   : > { %3501 = vmatprep.subr.mxu1 %v3609_v2 }
0x10b3   : > { %3502 = vmatpush3.msra.mxu1 %v3188_v61 }
0x10b4   : > { %3503 = vmatprep.subr.mxu1 %v3609_v2 }
0x10b5   : > { %3504 = vmatpush3.msra.mxu1 %v3187_v62 }
0x10b6   : > { %3505 = vmatprep.subr.mxu1 %v3609_v2 }
0x10b7   : > { %3506 = vmatpush3.msra.mxu1 %v3186_v63 }
0x10b8   : > { %3507 = vmatprep.subr.mxu1 %v3609_v2 }
0x10b9   : > { %3508 = vmatpush3.msra.mxu1 %v3185_v0 }
0x10ba   : > { %3509 = vmatprep.subr.mxu1 %v3609_v2 }
0x10bb   : > { %3510 = vmatpush3.msra.mxu1 %v3184_v1 }
0x10bc   : > { %3511 = vmatprep.subr.mxu1 %v3609_v2 }
0x10bd   : > { %3512 = vmatpush3.msra.mxu1 %v3183_v3 }
0x10be   : > { %3513 = vmatprep.subr.mxu1 %v3609_v2 }
0x10bf   : > { %3514 = vmatpush3.msra.mxu1 %v3182_v4 }
0x10c0   : > { %3515 = vmatprep.subr.mxu1 %v3609_v2 }
0x10c1   : > { %3516 = vmatpush3.msra.mxu1 %v3181_v5 }
0x10c2   : > { %3517 = vmatprep.subr.mxu1 %v3609_v2 }
0x10c3   : > { %3518 = vmatpush3.msra.mxu1 %v3180_v9 }
0x10c4   : > { %3519 = vmatprep.subr.mxu1 %v3609_v2 }
0x10c5   : > { %3520 = vmatpush3.msra.mxu1 %v3179_v6 }
0x10c6   : > { %3521 = vmatprep.subr.mxu1 %v3609_v2 }
0x10c7   : > { %3522 = vmatpush3.msra.mxu1 %v3178_v7 }
0x1168   : > { %v2699_v32 = vpop.f32.mrf.mxu1 }
0x1169   : > { %v2703_v34 = vadd.f32 %v2699_v32, %v4018_v52  ;;  %v3173_v52 = vld [vmem:[%s4304_s12 + $0x30] sm:$0xff] }
0x116a   : > { %v3479_v35 = vpop.f32.mrf.mxu1  ;;  %3483 = vmatpush3.msra.mxu0 %v3173_v52 }
0x116b   : > { %v4159_v36 = vadd.f32 %v3166_v33, %v2703_v34  ;;  %3484 = vmatprep.subr.mxu0 %v3609_v2  ;;  %v2968_v33 = vld [vmem:[%s4310_s18 + $0x18] sm:$0xff]  ;;  %v2967_v34 = vld [vmem:[%s4310_s18 + $0x10] sm:$0xff]  ;;  %v2966_v35 = vld [vmem:[%s4310_s18 + $0x8] sm:$0xff] }
0x116c   : > { %3485 = vmatpush3.msra.mxu0 %v3172_v45 }
0x116d   : > { %v2717_v37 = vsel %vm723_vm3, %v4159_v36, 0.0  ;;  %3486 = vmatprep.subr.mxu0 %v3609_v2 }
0x116e   : > { %2718 = vadd.xlane.f32.xlu1 %v2717_v37  ;;  %3487 = vmatpush3.msra.mxu0 %v3171_v46 }
0x116f   : > { %3526 = vmatprep.subr.mxu0 %v3609_v2 }
0x11f7   : > { %v2719_v38 = vpop.xlane.xlu1 %2718 }
0x11f8   : > { %v2720_v39 = vmul.f32 0.03125, %v2719_v38 }
0x11fa   : > { %v2721_v40 = vsub.f32 %v4159_v36, %v2720_v39 }
0x11fc   : > { %v2722_v41 = vmul.f32 %v2721_v40, %v2721_v40 }
0x11fe   : > { %v2723_v42 = vsel %vm723_vm3, %v2722_v41, 0.0  ;;  %v3196_v41 = vld [vmem:[%s4308_s16] ss:$0 sm:$0xff] }
0x11ff   : > { %2724 = vadd.xlane.f32.xlu0 %v2723_v42 }
0x1288   : > { %v2725_v47 = vpop.xlane.xlu0 %2724 }
0x1289   : > { %v2726_v48 = vmul.f32 0.03125, %v2725_v47 }
0x128b   : > { %v2727_v49 = vadd.f32 1e-05, %v2726_v48 }
0x128d   : > { %3595 = vrsqrt.f32 %v2727_v49 }
0x129a   : > { %v3596_v50 = vpop.eup %3595 }
0x129b   : > { %v2729_v51 = vmul.f32 %v3596_v50, %v2721_v40 }
0x129d   : > { %v2736_v54 = vmul.f32 %v3169_v44, %v2729_v51 }
0x129f   : > { %v2743_v55 = vadd.f32 %v3170_v53, %v2736_v54 }
0x12a1   : > { %3489 = vmatmul.mubr.msk.f32.vlgmr.msra.gmra.mxu0 %vm723_vm3, %v2743_v55 }
0x12a2   : > { %3534 = vmatprep.mubr.msk.f32.mxu0 %vm3610_vm1, %v3609_v2  ;;  %3527 = vmatpush3.msra.mxu0 %v2968_v33 }
0x12a3   : > { %3528 = vmatprep.subr.mxu0 %v3609_v2 }
0x12a4   : > { %3529 = vmatpush3.msra.mxu0 %v2967_v34 }
0x12a5   : > { %3530 = vmatprep.subr.mxu0 %v3609_v2 }
0x12a6   : > { %3531 = vmatpush3.msra.mxu0 %v2966_v35 }
0x12a7   : > { %3532 = vmatprep.subr.mxu0 %v3609_v2  ;;  %v3198_v2 = vld [vmem:[#allocation2] ss:$0 sm:$0xff] }
0x1361   : > { %v2826_v10 = vpop.f32.mrf.mxu0 }
0x1362   : > { %v2827_v11 = vadd.f32 %v3176_v8, %v2826_v10 }
0x1363   : > { %v3490_v12 = vpop.f32.mrf.mxu0 }
0x1364   : > { %v2831_v13 = vmul.f32 0.044715, %v2827_v11  ;;  %v2830_v19 = vmul.f32 0.5, %v2827_v11 }
0x1366   : > { %v2832_v14 = vmul.f32 %v2831_v13, %v2827_v11 }
0x1368   : > { %v2833_v15 = vmul.f32 %v2832_v14, %v2827_v11 }
0x136a   : > { %v2834_v16 = vadd.f32 %v2833_v15, %v2827_v11 }
0x136c   : > { %v2835_v17 = vmul.f32 0.7978846, %v2834_v16 }
0x136e   : > { %3597 = vtanh.f32 %v2835_v17 }
0x137b   : > { %v3598_v18 = vpop.eup %3597 }
0x137c   : > { %v2837_v20 = vadd.f32 1.0, %v3598_v18 }
0x137e   : > { %v2838_v21 = vmul.f32 %v2837_v20, %v2830_v19 }
0x1380   : > { %3524 = vmatmul.mubr.f32.vlgmr.msra.gmra.mxu1 %v2838_v21 }
0x1440   : > { %v2922_v22 = vpop.f32.mrf.mxu1 }
0x1441   : > { %v2926_v24 = vadd.f32 %v2922_v22, %v4159_v36  ;;  %v2965_v36 = vld [vmem:[%s4310_s18] sm:$0xff] }
0x1442   : > { %v3525_v25 = vpop.f32.mrf.mxu1  ;;  %3533 = vmatpush3.msra.mxu0 %v2965_v36 }
0x1443   : > { %v2935_v26 = vadd.f32 %v3195_v23, %v2926_v24 }
0x1445   : > { %v2938_v27 = vsel %vm723_vm3, %v2935_v26, 0.0 }
0x1446   : > { %2939 = vadd.xlane.f32.xlu0 %v2938_v27 }
0x14cf   : > { %v2940_v28 = vpop.xlane.xlu0 %2939 }
0x14d0   : > { %v2941_v29 = vmul.f32 0.03125, %v2940_v28 }
0x14d2   : > { %v2942_v30 = vsub.f32 %v2935_v26, %v2941_v29 }
0x14d4   : > { %v2943_v31 = vmul.f32 %v2942_v30, %v2942_v30 }
0x14d6   : > { %v2944_v32 = vsel %vm723_vm3, %v2943_v31, 0.0 }
0x14d7   : > { %2945 = vadd.xlane.f32.xlu1 %v2944_v32 }
0x1560   : > { %v2946_v37 = vpop.xlane.xlu1 %2945 }
0x1561   : > { %v2947_v38 = vmul.f32 0.03125, %v2946_v37 }
0x1563   : > { %v2948_v39 = vadd.f32 1e-05, %v2947_v38 }
0x1565   : > { %3599 = vrsqrt.f32 %v2948_v39 }
0x1572   : > { %v3600_v40 = vpop.eup %3599 }
0x1573   : > { %v2950_v42 = vmul.f32 %v3600_v40, %v2942_v30 }
0x1575   : > { %v2957_v52 = vmul.f32 %v3196_v41, %v2950_v42 }
0x1577   : > { %v2964_v45 = vadd.f32 %v3197_v43, %v2957_v52 }
0x1579   : > { %3535 = vmatmul.mubr.msk.f32.vlgmr.msra.gmra.mxu0 %vm723_vm3, %v2964_v45 }
0x1639   : > { %v3045_v46 = vpop.f32.mrf.mxu0 }
0x163a   : > { %v3046_v47 = vadd.f32 %v3198_v2, %v3045_v46 }
0x163b   : > { %v3536_v48 = vpop.f32.mrf.mxu0 }
0x163c   : > { %3050 = vst.msk [vmem:[%s626_s30] sm:$0xff] %vm3049_vm8, %v3046_v47 }
0x163d PF: > { %s32_s23 = sadd.s32 1, %s3607_s23  }
0x163e   : > { %p29_p4 = scmp.ge.s32.totalorder %s32_s23, 4  }
0x1640   :  { %31 = sbr.rel (!%p29_p4) target bundleno = 6 (0x6), region = 142 }

</bundles_post_ra>
